<compile_context>
chip_gen: v6e
topology: v6e:2x2x1
jax: 0.10.0
libtpu: 0.0.40
codegen_flags: <defaults>
</compile_context>

<pallas_src>
import functools

import numpy as np

import jax
import jax.numpy as jnp
from jax.experimental import pallas as pl
from jax.experimental.pallas import tpu as pltpu


_LANE = 128


def _round_up(x, m):
    return ((x + m - 1) // m) * m


# ---------------------------------------------------------------------------
# Kernel
# ---------------------------------------------------------------------------
def _make_kernel(epilogue, n_valid_cols, fuse_proj):
    """Tiled, block-sparse O = epilogue(A @ B + bias [, @ W2]).

    grid = (row blocks, max #nonzero col blocks per row block).  The inner
    axis is "arbitrary" (accumulated into a VMEM scratch), the row axis is
    "parallel".  Column-block ids / counts arrive via scalar prefetch.
    """

    def kernel(ids_ref, cnt_ref, a_ref, b_ref, bias_ref, *rest):
        if fuse_proj:
            w2_ref, o_ref, acc_ref = rest
        else:
            o_ref, acc_ref = rest

        i = pl.program_id(0)
        k = pl.program_id(1)

        @pl.when(k == 0)
        def _init():
            acc_ref[...] = jnp.zeros_like(acc_ref)

        # Skip padded (all-zero) column blocks: their ids repeat the last valid
        # block (no new DMA) and the MXU work is gated off here.
        @pl.when(k < cnt_ref[i])
        def _accumulate():
            acc_ref[...] += jnp.dot(
                a_ref[...], b_ref[...], preferred_element_type=jnp.float32
            )

        @pl.when(k == pl.num_programs(1) - 1)
        def _finalize():
            z = acc_ref[...] + bias_ref[...]
            if epilogue == "relu_proj":
                # Fused layer-1 epilogue: relu(A X W1 + b1) @ W2, emitted
                # directly as the (streaming-dtype) RHS of layer 2.
                h = jnp.maximum(z, 0.0)
                o_ref[...] = jnp.dot(
                    h, w2_ref[...], preferred_element_type=jnp.float32
                ).astype(o_ref.dtype)
            else:
                # Numerically stable log_softmax over the lane-padded feature
                # axis; padded lanes are masked out of the max/sum.
                col = jax.lax.broadcasted_iota(jnp.int32, z.shape, 1)
                valid = col < n_valid_cols
                zm = jnp.where(valid, z, -1e30)
                m = jnp.max(zm, axis=1, keepdims=True)
                e = jnp.where(valid, jnp.exp(zm - m), 0.0)
                lse = jnp.log(jnp.sum(e, axis=1, keepdims=True)) + m
                o_ref[...] = (z - lse).astype(o_ref.dtype)

    return kernel


def _gcn_aggregate(a_pad, blk_ids, blk_cnt, b, bias, *, epilogue, n_valid_cols,
                   tm, tk, vmem_limit, proj=None, out_dtype=jnp.float32):
    """epilogue(A_hat @ B + bias [ @ proj ]), block-sparse over dense A_hat."""
    n_pad = a_pad.shape[0]
    c_in = b.shape[1]
    c_out = proj.shape[1] if proj is not None else c_in
    nrb = n_pad // tm
    max_k = blk_ids.shape[0] // nrb  # flattened (nrb * max_k,) id table
    grid = (nrb, max_k)

    in_specs = [
        # A_hat tile: column block is data-dependent (scalar-prefetched id).
        pl.BlockSpec((tm, tk), lambda i, k, ids, cnt: (i, ids[i * max_k + k])),
        # Dense RHS tile for the same column block.
        pl.BlockSpec((tk, c_in), lambda i, k, ids, cnt: (ids[i * max_k + k], 0)),
        # Bias row (constant -> fetched once).
        pl.BlockSpec((1, c_in), lambda i, k, ids, cnt: (0, 0)),
    ]
    args = [blk_ids, blk_cnt, a_pad, b, bias]
    if proj is not None:
        in_specs.append(pl.BlockSpec((c_in, c_out), lambda i, k, ids, cnt: (0, 0)))
        args.append(proj)

    a_bytes = nrb * max_k * tm * tk * a_pad.dtype.itemsize
    b_bytes = nrb * max_k * tk * c_in * b.dtype.itemsize   # RHS re-read per step
    o_bytes = n_pad * c_out * jnp.dtype(out_dtype).itemsize
    flops = 2 * nrb * max_k * tm * tk * c_in
    if proj is not None:
        flops += 2 * n_pad * c_in * c_out
    transcendentals = n_pad * c_out if epilogue == "log_softmax" else 0

    return pl.pallas_call(
        _make_kernel(epilogue, n_valid_cols, proj is not None),
        out_shape=jax.ShapeDtypeStruct((n_pad, c_out), out_dtype),
        grid_spec=pltpu.PrefetchScalarGridSpec(
            num_scalar_prefetch=2,
            grid=grid,
            in_specs=in_specs,
            out_specs=pl.BlockSpec((tm, c_out), lambda i, k, ids, cnt: (i, 0)),
            scratch_shapes=[pltpu.VMEM((tm, c_in), jnp.float32)],
        ),
        compiler_params=pltpu.CompilerParams(
            dimension_semantics=("parallel", "arbitrary"),
            vmem_limit_bytes=vmem_limit,
        ),
        cost_estimate=pl.CostEstimate(
            flops=flops,
            transcendentals=transcendentals,
            bytes_accessed=a_bytes + b_bytes + o_bytes,
        ),
    )(*args)


# ---------------------------------------------------------------------------
# Graph preprocessing (built ONCE per graph, outside the jitted forward)
# ---------------------------------------------------------------------------
def build_normalized_adjacency(edge_index, num_nodes):
    """Dense D^{-1/2}(A + I)D^{-1/2} matching PyG gcn_norm (add_self_loops=True).

    Duplicate edges accumulate (scatter-add) like PyG; self loops are only
    added for nodes that do not already have one.
    """
    src = edge_index[0]
    dst = edge_index[1]
    a = jnp.zeros((num_nodes, num_nodes), jnp.float32)
    a = a.at[dst, src].add(1.0)  # message flows src -> dst (row = target)
    idx = jnp.arange(num_nodes)
    diag = a[idx, idx]
    a = a.at[idx, idx].set(jnp.where(diag > 0.0, diag, 1.0))
    deg = jnp.sum(a, axis=1)
    d_inv_sqrt = jnp.where(deg > 0, 1.0 / jnp.sqrt(deg), 0.0)
    return d_inv_sqrt[:, None] * a * d_inv_sqrt[None, :]


def select_config(num_nodes):
    """Generation-aware streaming dtype, tile sizes and VMEM limit."""
    stream_dtype = jnp.float32 if num_nodes <= 512 else jnp.bfloat16
    try:
        vmem_bytes = int(pltpu.get_tpu_info().vmem_capacity_bytes)
    except Exception:
        vmem_bytes = 64 * 1024 * 1024  # conservative (v7x-sized) fallback
    if vmem_bytes >= 96 * 1024 * 1024:        # v5e / v6e: 128 MiB VMEM
        tk_max, vmem_limit = 2048, 96 * 1024 * 1024
    else:                                     # v7x: 64 MiB VMEM
        tk_max, vmem_limit = 1024, 48 * 1024 * 1024
    n_min = _round_up(max(num_nodes, 1), _LANE)
    tk = min(tk_max, n_min)
    tm = min(1024, tk)          # tm divides tk (both multiples of 128)
    return tm, tk, stream_dtype, vmem_limit


def prepare_graph(edge_index, num_nodes, *, tm, tk, stream_dtype):
    """Padded A_hat in its streaming dtype + block-sparse column-block metadata."""
    n_pad = _round_up(num_nodes, tk)
    a_hat = build_normalized_adjacency(edge_index, num_nodes)
    a_pad = (
        jnp.zeros((n_pad, n_pad), stream_dtype)
        .at[:num_nodes, :num_nodes]
        .set(a_hat.astype(stream_dtype))
    )
    nrb, ncb = n_pad // tm, n_pad // tk
    blk_nz = np.asarray(
        jnp.any(a_pad.reshape(nrb, tm, ncb, tk) != 0, axis=(1, 3))
    )
    counts = blk_nz.sum(axis=1).astype(np.int32)          # (nrb,)
    max_k = max(1, int(counts.max()))
    ids = np.zeros((nrb, max_k), dtype=np.int32)
    for r in range(nrb):
        nz = np.flatnonzero(blk_nz[r])
        if nz.size:
            ids[r, : nz.size] = nz
            ids[r, nz.size:] = nz[-1]  # repeat last valid id -> no extra DMA
    # Flattened (SMEM-friendly 1-D) id table.
    return a_pad, jnp.asarray(ids.reshape(-1)), jnp.asarray(counts)


# ---------------------------------------------------------------------------
# Forward
# ---------------------------------------------------------------------------
@functools.partial(jax.jit, static_argnames=("num_nodes", "tm", "tk", "vmem_limit"))
def gkan_forward(a_pad, blk_ids, blk_cnt, x, w1, b1, w2, b2, *,
                 num_nodes, tm, tk, vmem_limit):
    n = num_nodes
    n_pad = a_pad.shape[0]
    hid_c = w1.shape[1]
    out_c = w2.shape[1]
    hid_p = _round_up(hid_c, _LANE)
    out_p = _round_up(out_c, _LANE)
    stream_dtype = a_pad.dtype

    # Tiny N x in x hid projection hoisted out of the A-tile loop.
    xw1 = jnp.dot(x, w1, preferred_element_type=jnp.float32)
    xw1_p = (
        jnp.zeros((n_pad, hid_p), stream_dtype)
        .at[:n, :hid_c]
        .set(xw1.astype(stream_dtype))
    )
    b1_p = jnp.zeros((1, hid_p), jnp.float32).at[0, :hid_c].set(b1)
    w2_p = jnp.zeros((hid_p, out_p), jnp.float32).at[:hid_c, :out_c].set(w2)
    b2_p = jnp.zeros((1, out_p), jnp.float32).at[0, :out_c].set(b2)

    # Layer 1 (fused): relu(A_hat @ (X W1) + b1) @ W2, emitted as layer-2 RHS.
    hw2 = _gcn_aggregate(
        a_pad, blk_ids, blk_cnt, xw1_p, b1_p,
        epilogue="relu_proj", n_valid_cols=hid_c,
        tm=tm, tk=tk, vmem_limit=vmem_limit,
        proj=w2_p, out_dtype=stream_dtype,
    )

    # F.dropout(x, training=self.training): identity in eval mode.
    # TODO(synk): training-mode dropout (random mask + 1/(1-p) scale) not emitted.

    # Layer 2: log_softmax(A_hat @ (h W2) + b2, dim=1).
    z_log = _gcn_aggregate(
        a_pad, blk_ids, blk_cnt, hw2, b2_p,
        epilogue="log_softmax", n_valid_cols=out_c,
        tm=tm, tk=tk, vmem_limit=vmem_limit,
        proj=None, out_dtype=jnp.float32,
    )

    # Slice padded rows / lanes off outside the kernel.
    return z_log[:n, :out_c]


def reference_forward(x, edge_index, w1, b1, w2, b2, num_nodes):
    a_hat = build_normalized_adjacency(edge_index, num_nodes)
    h = a_hat @ (x @ w1) + b1
    h = jnp.maximum(h, 0.0)
    z = a_hat @ (h @ w2) + b2
    return jax.nn.log_softmax(z, axis=1)


if __name__ == "__main__":
    # Small shapes implied by the module: a graph with N nodes + feature dims.
    num_nodes = 16
    in_channels = 8
    hidden_channels = 32
    out_channels = 4
    num_edges = 32

    key = jax.random.PRNGKey(0)
    kx, ke, kw1, kw2 = jax.random.split(key, 4)

    x = jax.random.normal(kx, (num_nodes, in_channels), jnp.float32)
    edge_index = jax.random.randint(ke, (2, num_edges), 0, num_nodes, jnp.int32)

    # Deterministic Glorot-style init matching GCNConv shapes.
    w1 = jax.random.normal(kw1, (in_channels, hidden_channels), jnp.float32) * (
        1.0 / jnp.sqrt(in_channels)
    )
    b1 = jnp.zeros((hidden_channels,), jnp.float32)
    w2 = jax.random.normal(kw2, (hidden_channels, out_channels), jnp.float32) * (
        1.0 / jnp.sqrt(hidden_channels)
    )
    b2 = jnp.zeros((out_channels,), jnp.float32)

    # Graph preprocessing (once per graph, outside the jitted forward).
    tm, tk, stream_dtype, vmem_limit = select_config(num_nodes)
    a_pad, blk_ids, blk_cnt = prepare_graph(
        edge_index, num_nodes, tm=tm, tk=tk, stream_dtype=stream_dtype
    )

    out = gkan_forward(
        a_pad, blk_ids, blk_cnt, x, w1, b1, w2, b2,
        num_nodes=num_nodes, tm=tm, tk=tk, vmem_limit=vmem_limit,
    )
    out = jax.block_until_ready(out)

    ref = reference_forward(x, edge_index, w1, b1, w2, b2, num_nodes)
    assert out.shape == (num_nodes, out_channels)
    assert bool(jnp.all(jnp.isfinite(out)))
    # Small graphs stream A_hat / features in f32, so this tolerance is loose.
    assert jnp.allclose(out, ref, atol=2e-2, rtol=2e-2)

    print("KERNEL_OK")
</pallas_src>

<mosaic_0001>
module attributes {stable_mosaic.version = 11 : i64} {
  func.func @kernel(%arg0: i32, %arg1: i32, %arg2: memref<1xi32, #tpu.memory_space<smem>>, %arg3: memref<1xi32, #tpu.memory_space<smem>>, %arg4: memref<128x128xf32, #tpu.memory_space<vmem>>, %arg5: memref<128x128xf32, #tpu.memory_space<vmem>>, %arg6: memref<1x128xf32, #tpu.memory_space<vmem>>, %arg7: memref<128x128xf32, #tpu.memory_space<vmem>>, %arg8: memref<128x128xf32, #tpu.memory_space<vmem>>, %arg9: memref<128x128xf32, #tpu.memory_space<vmem>>) attributes {dimension_semantics = [#tpu.dimension_semantics<parallel>, #tpu.dimension_semantics<arbitrary>], iteration_bounds = array<i64: 1, 1>, scalar_prefetch = 2 : i64, scratch_operands = 1 : i64, tpu.core_type = #tpu.core_type<tc>, window_params = [{transform_indices = @transform_0, window_bounds = array<i64: 128, 128>}, {transform_indices = @transform_1, window_bounds = array<i64: 128, 128>}, {pipeline_mode = #tpu.pipeline_mode<synchronous>, transform_indices = @transform_2, window_bounds = array<i64: 1, 128>}, {pipeline_mode = #tpu.pipeline_mode<synchronous>, transform_indices = @transform_3, window_bounds = array<i64: 128, 128>}, {transform_indices = @transform_4, window_bounds = array<i64: 128, 128>}]} {
    %c0_i32 = arith.constant 0 : i32
    %0 = arith.cmpi eq, %arg1, %c0_i32 : i32
    %1 = arith.extui %0 : i1 to i32
    %c0_i32_0 = arith.constant 0 : i32
    %2 = arith.cmpi ne, %1, %c0_i32_0 : i32
    scf.if %2 {
      %cst = arith.constant 0.000000e+00 : f32
      %11 = vector.broadcast %cst : f32 to vector<128x128xf32>
      %c0 = arith.constant 0 : index
      %c0_4 = arith.constant 0 : index
      %12 = vector.load %arg9[%c0, %c0_4] : memref<128x128xf32, #tpu.memory_space<vmem>>, vector<128x128xf32>
      tpu.vector_store %arg9[%c0, %c0_4], %11 {strides = array<i32>} : memref<128x128xf32, #tpu.memory_space<vmem>>, vector<128x128xf32>,
    } else {
    }
    %3 = arith.index_cast %arg0 : i32 to index
    %4 = memref.load %arg3[%3] : memref<1xi32, #tpu.memory_space<smem>>
    %5 = arith.cmpi slt, %arg1, %4 : i32
    %6 = arith.extui %5 : i1 to i32
    %c0_i32_1 = arith.constant 0 : i32
    %7 = arith.cmpi ne, %6, %c0_i32_1 : i32
    scf.if %7 {
      %c0 = arith.constant 0 : index
      %c0_4 = arith.constant 0 : index
      %11 = vector.load %arg9[%c0, %c0_4] : memref<128x128xf32, #tpu.memory_space<vmem>>, vector<128x128xf32>
      %c0_5 = arith.constant 0 : index
      %c0_6 = arith.constant 0 : index
      %12 = vector.load %arg4[%c0_5, %c0_6] : memref<128x128xf32, #tpu.memory_space<vmem>>, vector<128x128xf32>
      %c0_7 = arith.constant 0 : index
      %c0_8 = arith.constant 0 : index
      %13 = vector.load %arg5[%c0_7, %c0_8] : memref<128x128xf32, #tpu.memory_space<vmem>>, vector<128x128xf32>
      %cst = arith.constant dense<0.000000e+00> : vector<128x128xf32>
      %14 = tpu.matmul %12, %13, %cst {dimension_numbers = #tpu.dot_dimension_numbers<[1], [0], [0], [1], [0, 0, 1, 1], [], []>} : vector<128x128xf32>, vector<128x128xf32>, vector<128x128xf32> -> vector<128x128xf32>
      %15 = arith.addf %11, %14 : vector<128x128xf32>
      %c0_9 = arith.constant 0 : index
      %c0_10 = arith.constant 0 : index
      %16 = vector.load %arg9[%c0_9, %c0_10] : memref<128x128xf32, #tpu.memory_space<vmem>>, vector<128x128xf32>
      tpu.vector_store %arg9[%c0_9, %c0_10], %15 {strides = array<i32>} : memref<128x128xf32, #tpu.memory_space<vmem>>, vector<128x128xf32>,
    } else {
    }
    %c0_i32_2 = arith.constant 0 : i32
    %8 = arith.cmpi eq, %arg1, %c0_i32_2 : i32
    %9 = arith.extui %8 : i1 to i32
    %c0_i32_3 = arith.constant 0 : i32
    %10 = arith.cmpi ne, %9, %c0_i32_3 : i32
    scf.if %10 {
      %c0 = arith.constant 0 : index
      %c0_4 = arith.constant 0 : index
      %11 = vector.load %arg9[%c0, %c0_4] : memref<128x128xf32, #tpu.memory_space<vmem>>, vector<128x128xf32>
      %c0_5 = arith.constant 0 : index
      %c0_6 = arith.constant 0 : index
      %12 = vector.load %arg6[%c0_5, %c0_6] : memref<1x128xf32, #tpu.memory_space<vmem>>, vector<1x128xf32>
      %13 = vector.broadcast %12 : vector<1x128xf32> to vector<128x128xf32>
      %14 = arith.addf %11, %13 : vector<128x128xf32>
      %cst = arith.constant 0.000000e+00 : f32
      %15 = vector.broadcast %cst : f32 to vector<128x128xf32>
      %16 = arith.maximumf %14, %15 : vector<128x128xf32>
      %c0_7 = arith.constant 0 : index
      %c0_8 = arith.constant 0 : index
      %17 = vector.load %arg7[%c0_7, %c0_8] : memref<128x128xf32, #tpu.memory_space<vmem>>, vector<128x128xf32>
      %cst_9 = arith.constant dense<0.000000e+00> : vector<128x128xf32>
      %18 = tpu.matmul %16, %17, %cst_9 {dimension_numbers = #tpu.dot_dimension_numbers<[1], [0], [0], [1], [0, 0, 1, 1], [], []>} : vector<128x128xf32>, vector<128x128xf32>, vector<128x128xf32> -> vector<128x128xf32>
      %c0_10 = arith.constant 0 : index
      %c0_11 = arith.constant 0 : index
      %19 = vector.load %arg8[%c0_10, %c0_11] : memref<128x128xf32, #tpu.memory_space<vmem>>, vector<128x128xf32>
      tpu.vector_store %arg8[%c0_10, %c0_11], %18 {strides = array<i32>} : memref<128x128xf32, #tpu.memory_space<vmem>>, vector<128x128xf32>,
    } else {
    }
    return
  }
  func.func @transform_0(%arg0: i32, %arg1: i32, %arg2: memref<1xi32, #tpu.memory_space<smem>>, %arg3: memref<1xi32, #tpu.memory_space<smem>>) -> (i32, i32) {
    %c1_i32 = arith.constant 1 : i32
    %0 = arith.muli %arg0, %c1_i32 : i32
    %1 = arith.addi %0, %arg1 : i32
    %2 = arith.index_cast %1 : i32 to index
    %3 = memref.load %arg2[%2] : memref<1xi32, #tpu.memory_space<smem>>
    %c0_i32 = arith.constant 0 : i32
    return %arg0, %3 : i32, i32
  }
  func.func @transform_1(%arg0: i32, %arg1: i32, %arg2: memref<1xi32, #tpu.memory_space<smem>>, %arg3: memref<1xi32, #tpu.memory_space<smem>>) -> (i32, i32) {
    %c1_i32 = arith.constant 1 : i32
    %0 = arith.muli %arg0, %c1_i32 : i32
    %1 = arith.addi %0, %arg1 : i32
    %2 = arith.index_cast %1 : i32 to index
    %3 = memref.load %arg2[%2] : memref<1xi32, #tpu.memory_space<smem>>
    %c0_i32 = arith.constant 0 : i32
    %c0_i32_0 = arith.constant 0 : i32
    return %3, %c0_i32 : i32, i32
  }
  func.func @transform_2(%arg0: i32, %arg1: i32, %arg2: memref<1xi32, #tpu.memory_space<smem>>, %arg3: memref<1xi32, #tpu.memory_space<smem>>) -> (i32, i32) {
    %c0_i32 = arith.constant 0 : i32
    %c0_i32_0 = arith.constant 0 : i32
    %c0_i32_1 = arith.constant 0 : i32
    return %c0_i32, %c0_i32_0 : i32, i32
  }
  func.func @transform_3(%arg0: i32, %arg1: i32, %arg2: memref<1xi32, #tpu.memory_space<smem>>, %arg3: memref<1xi32, #tpu.memory_space<smem>>) -> (i32, i32) {
    %c0_i32 = arith.constant 0 : i32
    %c0_i32_0 = arith.constant 0 : i32
    %c0_i32_1 = arith.constant 0 : i32
    return %c0_i32, %c0_i32_0 : i32, i32
  }
  func.func @transform_4(%arg0: i32, %arg1: i32, %arg2: memref<1xi32, #tpu.memory_space<smem>>, %arg3: memref<1xi32, #tpu.memory_space<smem>>) -> (i32, i32) {
    %c0_i32 = arith.constant 0 : i32
    %c0_i32_0 = arith.constant 0 : i32
    return %arg0, %c0_i32 : i32, i32
  }
}

module attributes {stable_mosaic.version = 11 : i64} {
  func.func @kernel(%arg0: i32, %arg1: i32, %arg2: memref<1xi32, #tpu.memory_space<smem>>, %arg3: memref<1xi32, #tpu.memory_space<smem>>, %arg4: memref<128x128xf32, #tpu.memory_space<vmem>>, %arg5: memref<128x128xf32, #tpu.memory_space<vmem>>, %arg6: memref<1x128xf32, #tpu.memory_space<vmem>>, %arg7: memref<128x128xf32, #tpu.memory_space<vmem>>, %arg8: memref<128x128xf32, #tpu.memory_space<vmem>>) attributes {dimension_semantics = [#tpu.dimension_semantics<parallel>, #tpu.dimension_semantics<arbitrary>], iteration_bounds = array<i64: 1, 1>, scalar_prefetch = 2 : i64, scratch_operands = 1 : i64, tpu.core_type = #tpu.core_type<tc>, window_params = [{transform_indices = @transform_0, window_bounds = array<i64: 128, 128>}, {transform_indices = @transform_1, window_bounds = array<i64: 128, 128>}, {pipeline_mode = #tpu.pipeline_mode<synchronous>, transform_indices = @transform_2, window_bounds = array<i64: 1, 128>}, {transform_indices = @transform_3, window_bounds = array<i64: 128, 128>}]} {
    %c0_i32 = arith.constant 0 : i32
    %0 = arith.cmpi eq, %arg1, %c0_i32 : i32
    %1 = arith.extui %0 : i1 to i32
    %c0_i32_0 = arith.constant 0 : i32
    %2 = arith.cmpi ne, %1, %c0_i32_0 : i32
    scf.if %2 {
      %cst = arith.constant 0.000000e+00 : f32
      %11 = vector.broadcast %cst : f32 to vector<128x128xf32>
      %c0 = arith.constant 0 : index
      %c0_4 = arith.constant 0 : index
      %12 = vector.load %arg8[%c0, %c0_4] : memref<128x128xf32, #tpu.memory_space<vmem>>, vector<128x128xf32>
      tpu.vector_store %arg8[%c0, %c0_4], %11 {strides = array<i32>} : memref<128x128xf32, #tpu.memory_space<vmem>>, vector<128x128xf32>,
    } else {
    }
    %3 = arith.index_cast %arg0 : i32 to index
    %4 = memref.load %arg3[%3] : memref<1xi32, #tpu.memory_space<smem>>
    %5 = arith.cmpi slt, %arg1, %4 : i32
    %6 = arith.extui %5 : i1 to i32
    %c0_i32_1 = arith.constant 0 : i32
    %7 = arith.cmpi ne, %6, %c0_i32_1 : i32
    scf.if %7 {
      %c0 = arith.constant 0 : index
      %c0_4 = arith.constant 0 : index
      %11 = vector.load %arg8[%c0, %c0_4] : memref<128x128xf32, #tpu.memory_space<vmem>>, vector<128x128xf32>
      %c0_5 = arith.constant 0 : index
      %c0_6 = arith.constant 0 : index
      %12 = vector.load %arg4[%c0_5, %c0_6] : memref<128x128xf32, #tpu.memory_space<vmem>>, vector<128x128xf32>
      %c0_7 = arith.constant 0 : index
      %c0_8 = arith.constant 0 : index
      %13 = vector.load %arg5[%c0_7, %c0_8] : memref<128x128xf32, #tpu.memory_space<vmem>>, vector<128x128xf32>
      %cst = arith.constant dense<0.000000e+00> : vector<128x128xf32>
      %14 = tpu.matmul %12, %13, %cst {dimension_numbers = #tpu.dot_dimension_numbers<[1], [0], [0], [1], [0, 0, 1, 1], [], []>} : vector<128x128xf32>, vector<128x128xf32>, vector<128x128xf32> -> vector<128x128xf32>
      %15 = arith.addf %11, %14 : vector<128x128xf32>
      %c0_9 = arith.constant 0 : index
      %c0_10 = arith.constant 0 : index
      %16 = vector.load %arg8[%c0_9, %c0_10] : memref<128x128xf32, #tpu.memory_space<vmem>>, vector<128x128xf32>
      tpu.vector_store %arg8[%c0_9, %c0_10], %15 {strides = array<i32>} : memref<128x128xf32, #tpu.memory_space<vmem>>, vector<128x128xf32>,
    } else {
    }
    %c0_i32_2 = arith.constant 0 : i32
    %8 = arith.cmpi eq, %arg1, %c0_i32_2 : i32
    %9 = arith.extui %8 : i1 to i32
    %c0_i32_3 = arith.constant 0 : i32
    %10 = arith.cmpi ne, %9, %c0_i32_3 : i32
    scf.if %10 {
      %c0 = arith.constant 0 : index
      %c0_4 = arith.constant 0 : index
      %11 = vector.load %arg8[%c0, %c0_4] : memref<128x128xf32, #tpu.memory_space<vmem>>, vector<128x128xf32>
      %c0_5 = arith.constant 0 : index
      %c0_6 = arith.constant 0 : index
      %12 = vector.load %arg6[%c0_5, %c0_6] : memref<1x128xf32, #tpu.memory_space<vmem>>, vector<1x128xf32>
      %13 = vector.broadcast %12 : vector<1x128xf32> to vector<128x128xf32>
      %14 = arith.addf %11, %13 : vector<128x128xf32>
      %15 = tpu.iota {dimensions = array<i32: 1>} : vector<128x128xi32>
      %c4_i32 = arith.constant 4 : i32
      %16 = vector.broadcast %c4_i32 : i32 to vector<128x128xi32>
      %17 = arith.cmpi slt, %15, %16 : vector<128x128xi32>
      %cst = arith.constant -1.000000e+30 : f32
      %18 = vector.broadcast %cst : f32 to vector<128x128xf32>
      %19 = arith.select %17, %14, %18 : vector<128x128xi1>, vector<128x128xf32>
      %cst_7 = arith.constant dense<0xFF800000> : vector<128xf32>
      %20 = vector.multi_reduction <maximumf>, %19, %cst_7 [1] : vector<128x128xf32> to vector<128xf32>
      %21 = vector.shape_cast %20 : vector<128xf32> to vector<128x1xf32>
      %22 = vector.broadcast %21 : vector<128x1xf32> to vector<128x128xf32>
      %23 = arith.subf %19, %22 : vector<128x128xf32>
      %24 = math.exp %23 : vector<128x128xf32>
      %cst_8 = arith.constant 0.000000e+00 : f32
      %25 = vector.broadcast %cst_8 : f32 to vector<128x128xf32>
      %26 = arith.select %17, %24, %25 : vector<128x128xi1>, vector<128x128xf32>
      %cst_9 = arith.constant dense<0.000000e+00> : vector<128xf32>
      %27 = vector.multi_reduction <add>, %26, %cst_9 [1] : vector<128x128xf32> to vector<128xf32>
      %28 = vector.shape_cast %27 : vector<128xf32> to vector<128x1xf32>
      %29 = math.log %28 : vector<128x1xf32>
      %30 = arith.addf %29, %21 : vector<128x1xf32>
      %31 = vector.broadcast %30 : vector<128x1xf32> to vector<128x128xf32>
      %32 = arith.subf %14, %31 : vector<128x128xf32>
      %c0_10 = arith.constant 0 : index
      %c0_11 = arith.constant 0 : index
      %33 = vector.load %arg7[%c0_10, %c0_11] : memref<128x128xf32, #tpu.memory_space<vmem>>, vector<128x128xf32>
      tpu.vector_store %arg7[%c0_10, %c0_11], %32 {strides = array<i32>} : memref<128x128xf32, #tpu.memory_space<vmem>>, vector<128x128xf32>,
    } else {
    }
    return
  }
  func.func @transform_0(%arg0: i32, %arg1: i32, %arg2: memref<1xi32, #tpu.memory_space<smem>>, %arg3: memref<1xi32, #tpu.memory_space<smem>>) -> (i32, i32) {
    %c1_i32 = arith.constant 1 : i32
    %0 = arith.muli %arg0, %c1_i32 : i32
    %1 = arith.addi %0, %arg1 : i32
    %2 = arith.index_cast %1 : i32 to index
    %3 = memref.load %arg2[%2] : memref<1xi32, #tpu.memory_space<smem>>
    %c0_i32 = arith.constant 0 : i32
    return %arg0, %3 : i32, i32
  }
  func.func @transform_1(%arg0: i32, %arg1: i32, %arg2: memref<1xi32, #tpu.memory_space<smem>>, %arg3: memref<1xi32, #tpu.memory_space<smem>>) -> (i32, i32) {
    %c1_i32 = arith.constant 1 : i32
    %0 = arith.muli %arg0, %c1_i32 : i32
    %1 = arith.addi %0, %arg1 : i32
    %2 = arith.index_cast %1 : i32 to index
    %3 = memref.load %arg2[%2] : memref<1xi32, #tpu.memory_space<smem>>
    %c0_i32 = arith.constant 0 : i32
    %c0_i32_0 = arith.constant 0 : i32
    return %3, %c0_i32 : i32, i32
  }
  func.func @transform_2(%arg0: i32, %arg1: i32, %arg2: memref<1xi32, #tpu.memory_space<smem>>, %arg3: memref<1xi32, #tpu.memory_space<smem>>) -> (i32, i32) {
    %c0_i32 = arith.constant 0 : i32
    %c0_i32_0 = arith.constant 0 : i32
    %c0_i32_1 = arith.constant 0 : i32
    return %c0_i32, %c0_i32_0 : i32, i32
  }
  func.func @transform_3(%arg0: i32, %arg1: i32, %arg2: memref<1xi32, #tpu.memory_space<smem>>, %arg3: memref<1xi32, #tpu.memory_space<smem>>) -> (i32, i32) {
    %c0_i32 = arith.constant 0 : i32
    %c0_i32_0 = arith.constant 0 : i32
    return %arg0, %c0_i32 : i32, i32
  }
}

</mosaic_0001>

<bundles_post_ra>
// kernel: gkan_forward.3
= control target key start
LH: loop header
LB: loop body
LE: loop exit
PB: predicated region body
PF: predicated region fallthrough
CT: control target
= control target key end

     0   :  { %v793_v0 = vmov 0.0   ;;  %s1160_s0 = inlined_call_operand.<no memory space> [shape: s32[1], index: 0, kind: input, shape index: {}]   ;;  %s1161_s1 = inlined_call_operand.<no memory space> [shape: s32[1], index: 1, kind: input, shape index: {}]   ;;  %s1162_s4 = inlined_call_operand.vmem [shape: f32[1,128], index: 4, kind: input, shape index: {}]   ;;  %s1163_s5 = inlined_call_operand.vmem [shape: f32[128,128], index: 5, kind: output, shape index: {}]   ;;  %s1164_s2 = inlined_call_operand.vmem [shape: f32[128,128], index: 2, kind: input, shape index: {}]   ;;  %s1165_s3 = inlined_call_operand.vmem [shape: f32[128,128], index: 3, kind: input, shape index: {}]  }
   0x1   :  { %p51_p0 = scmp.lt.s32.totalorder %s1160_s0, 0  ;;  %s603_s22 = sshll.u32 %s1160_s0, 4  ;;  %71 = vst [vmem:[#allocation2 + $0x30] sm:$0xff] %v793_v0  ;;  %72 = vst [vmem:[#allocation2] sm:$0xff] %v793_v0 }
   0x2   :  { %73 = vst [vmem:[#allocation2 + $0x58] sm:$0xff] %v793_v0  ;;  %74 = vst [vmem:[#allocation2 + $0x18] sm:$0xff] %v793_v0  ;;  %p60_p1 = scmp.lt.s32.totalorder %s603_s22, 15  ;;  %p606_p2 = scmp.le.s32.totalorder %s1161_s1, 0 }
   0x3   :  { %75 = vst [vmem:[#allocation2 + $0x50] sm:$0xff] %v793_v0  ;;  %76 = vst [vmem:[#allocation2 + $0x68] sm:$0xff] %v793_v0  ;;  %s1167_s0 = smov (!%p51_p0, %s1160_s0), 0 }
   0x4   :  { %77 = vst [vmem:[#allocation2 + $0x8] sm:$0xff] %v793_v0  ;;  %78 = vst [vmem:[#allocation2 + $0x48] sm:$0xff] %v793_v0  ;;  %s1169_s22 = smov (!%p60_p1, %s603_s22), 15  ;;  %s602_s27 = sshll.u32 %s1167_s0, 3 }
   0x5   :  { %79 = vst [vmem:[#allocation2 + $0x40] sm:$0xff] %v793_v0  ;;  %80 = vst [vmem:[#allocation2 + $0x20] sm:$0xff] %v793_v0  ;;  %s840_s30 = scalar_lea.vmem %s1164_s2, %s602_s27  ;;  %s604_s6 = sshll.u32 %s1169_s22, 3 }
   0x6   :  { %81 = vst [vmem:[#allocation2 + $0x10] sm:$0xff] %v793_v0  ;;  %82 = vst [vmem:[#allocation2 + $0x38] sm:$0xff] %v793_v0  ;;  %s845_s9 = scalar_lea.vmem %s1165_s3, %s604_s6  ;;  %91 = sbr.rel (%p606_p2) target bundleno = 255 (0xff), region = 21 }
   0x7   :  { %83 = vst [vmem:[#allocation2 + $0x60] sm:$0xff] %v793_v0  ;;  %84 = vst [vmem:[#allocation2 + $0x70] sm:$0xff] %v793_v0 }
   0x8   :  { %85 = vst [vmem:[#allocation2 + $0x78] sm:$0xff] %v793_v0  ;;  %86 = vst [vmem:[#allocation2 + $0x28] sm:$0xff] %v793_v0 }
   0xb   :  { %v139_v1 = vld [vmem:[%s845_s9 + $0x78] sm:$0xff]  ;;  %v138_v2 = vld [vmem:[%s845_s9 + $0x70] sm:$0xff]  ;;  %v137_v3 = vld [vmem:[%s845_s9 + $0x68] sm:$0xff] }
   0xc   :  { %640 = vmatprep.subr.mxu0 %v139_v1  ;;  %696 = vmatprep.subr.mxu1 %v139_v1  ;;  %v136_v4 = vld [vmem:[%s845_s9 + $0x60] sm:$0xff]  ;;  %v135_v5 = vld [vmem:[%s845_s9 + $0x58] sm:$0xff]  ;;  %v134_v6 = vld [vmem:[%s845_s9 + $0x50] sm:$0xff] }
   0xd   :  { %641 = vmatpush3.msra.mxu0 %v139_v1  ;;  %712 = vmatpush3.msra.mxu1 %v139_v1  ;;  %v133_v7 = vld [vmem:[%s845_s9 + $0x48] sm:$0xff]  ;;  %v132_v8 = vld [vmem:[%s845_s9 + $0x40] sm:$0xff]  ;;  %v131_v9 = vld [vmem:[%s845_s9 + $0x38] sm:$0xff] }
   0xe   :  { %642 = vmatprep.subr.mxu0 %v138_v2  ;;  %697 = vmatprep.subr.mxu1 %v138_v2  ;;  %v130_v10 = vld [vmem:[%s845_s9 + $0x30] sm:$0xff]  ;;  %v129_v11 = vld [vmem:[%s845_s9 + $0x28] sm:$0xff]  ;;  %v128_v12 = vld [vmem:[%s845_s9 + $0x20] sm:$0xff] }
   0xf   :  { %643 = vmatpush3.msra.mxu0 %v138_v2  ;;  %713 = vmatpush3.msra.mxu1 %v138_v2  ;;  %v127_v13 = vld [vmem:[%s845_s9 + $0x18] sm:$0xff]  ;;  %v126_v14 = vld [vmem:[%s845_s9 + $0x10] sm:$0xff]  ;;  %v125_v15 = vld [vmem:[%s845_s9 + $0x8] sm:$0xff] }
  0x10   :  { %644 = vmatprep.subr.mxu0 %v137_v3  ;;  %698 = vmatprep.subr.mxu1 %v137_v3  ;;  %v124_v16 = vld [vmem:[%s845_s9] sm:$0xff]  ;;  %v109_v19 = vld [vmem:[%s840_s30 + $0x8] sm:$0xff]  ;;  %v110_v21 = vld [vmem:[%s840_s30 + $0x10] sm:$0xff] }
  0x11   :  { %645 = vmatpush3.msra.mxu0 %v137_v3  ;;  %714 = vmatpush3.msra.mxu1 %v137_v3  ;;  %v108_v17 = vld [vmem:[%s840_s30] sm:$0xff]  ;;  %v117_v20 = vld [vmem:[%s840_s30 + $0x48] sm:$0xff]  ;;  %v118_v22 = vld [vmem:[%s840_s30 + $0x50] sm:$0xff] }
  0x12   :  { %646 = vmatprep.subr.mxu0 %v136_v4  ;;  %699 = vmatprep.subr.mxu1 %v136_v4  ;;  %v116_v18 = vld [vmem:[%s840_s30 + $0x40] sm:$0xff]  ;;  %v111_v23 = vld [vmem:[%s840_s30 + $0x18] sm:$0xff]  ;;  %v113_v27 = vld [vmem:[%s840_s30 + $0x28] sm:$0xff] }
  0x13   :  { %647 = vmatpush3.msra.mxu0 %v136_v4  ;;  %715 = vmatpush3.msra.mxu1 %v136_v4  ;;  %v119_v24 = vld [vmem:[%s840_s30 + $0x58] sm:$0xff]  ;;  %v112_v25 = vld [vmem:[%s840_s30 + $0x20] sm:$0xff]  ;;  %v121_v28 = vld [vmem:[%s840_s30 + $0x68] sm:$0xff] }
  0x14   :  { %648 = vmatprep.subr.mxu0 %v135_v5  ;;  %700 = vmatprep.subr.mxu1 %v135_v5  ;;  %v120_v26 = vld [vmem:[%s840_s30 + $0x60] sm:$0xff]  ;;  %v114_v29 = vld [vmem:[%s840_s30 + $0x30] sm:$0xff]  ;;  %v115_v31 = vld [vmem:[%s840_s30 + $0x38] sm:$0xff] }
  0x15   :  { %649 = vmatpush3.msra.mxu0 %v135_v5  ;;  %716 = vmatpush3.msra.mxu1 %v135_v5  ;;  %v122_v30 = vld [vmem:[%s840_s30 + $0x70] sm:$0xff]  ;;  %v123_v32 = vld [vmem:[%s840_s30 + $0x78] sm:$0xff]  ;;  %v93_v33 = vld [vmem:[#allocation2] sm:$0xff] }
  0x16   :  { %650 = vmatprep.subr.mxu0 %v134_v6  ;;  %701 = vmatprep.subr.mxu1 %v134_v6  ;;  %v101_v34 = vld [vmem:[#allocation2 + $0x20] sm:$0xff]  ;;  %v92_v37 = vld [vmem:[#allocation2 + $0x30] sm:$0xff]  ;;  %v95_v43 = vld [vmem:[#allocation2 + $0x18] sm:$0xff] }
  0x17   :  { %651 = vmatpush3.msra.mxu0 %v134_v6  ;;  %717 = vmatpush3.msra.mxu1 %v134_v6  ;;  %v100_v38 = vld [vmem:[#allocation2 + $0x40] sm:$0xff]  ;;  %v103_v44 = vld [vmem:[#allocation2 + $0x38] sm:$0xff]  ;;  %v102_v50 = vld [vmem:[#allocation2 + $0x10] sm:$0xff] }
  0x18   :  { %652 = vmatprep.subr.mxu0 %v133_v7  ;;  %702 = vmatprep.subr.mxu1 %v133_v7  ;;  %v94_v49 = vld [vmem:[#allocation2 + $0x58] sm:$0xff]  ;;  %v97_v55 = vld [vmem:[#allocation2 + $0x68] sm:$0xff]  ;;  %v105_v56 = vld [vmem:[#allocation2 + $0x70] sm:$0xff] }
  0x19   :  { %653 = vmatpush3.msra.mxu0 %v133_v7  ;;  %718 = vmatpush3.msra.mxu1 %v133_v7  ;;  %v96_v61 = vld [vmem:[#allocation2 + $0x50] sm:$0xff]  ;;  %v104_v62 = vld [vmem:[#allocation2 + $0x60] sm:$0xff]  ;;  %v99_v3 = vld [vmem:[#allocation2 + $0x48] sm:$0xff] }
  0x1a   :  { %654 = vmatprep.subr.mxu0 %v132_v8  ;;  %703 = vmatprep.subr.mxu1 %v132_v8  ;;  %v107_v4 = vld [vmem:[#allocation2 + $0x28] sm:$0xff] }
  0x1b   :  { %655 = vmatpush3.msra.mxu0 %v132_v8  ;;  %719 = vmatpush3.msra.mxu1 %v132_v8 }
  0x1c   :  { %656 = vmatprep.subr.mxu0 %v131_v9  ;;  %704 = vmatprep.subr.mxu1 %v131_v9 }
  0x1d   :  { %657 = vmatpush3.msra.mxu0 %v131_v9  ;;  %720 = vmatpush3.msra.mxu1 %v131_v9  ;;  %v98_v9 = vld [vmem:[#allocation2 + $0x8] sm:$0xff] }
  0x1e   :  { %658 = vmatprep.subr.mxu0 %v130_v10  ;;  %705 = vmatprep.subr.mxu1 %v130_v10 }
  0x1f   :  { %659 = vmatpush3.msra.mxu0 %v130_v10  ;;  %721 = vmatpush3.msra.mxu1 %v130_v10  ;;  %v106_v10 = vld [vmem:[#allocation2 + $0x78] sm:$0xff] }
  0x20   :  { %660 = vmatprep.subr.mxu0 %v129_v11  ;;  %706 = vmatprep.subr.mxu1 %v129_v11 }
  0x21   :  { %661 = vmatpush3.msra.mxu0 %v129_v11  ;;  %722 = vmatpush3.msra.mxu1 %v129_v11 }
  0x22   :  { %662 = vmatprep.subr.mxu0 %v128_v12  ;;  %707 = vmatprep.subr.mxu1 %v128_v12 }
  0x23   :  { %663 = vmatpush3.msra.mxu0 %v128_v12  ;;  %723 = vmatpush3.msra.mxu1 %v128_v12 }
  0x24   :  { %664 = vmatprep.subr.mxu0 %v127_v13  ;;  %708 = vmatprep.subr.mxu1 %v127_v13 }
  0x25   :  { %665 = vmatpush3.msra.mxu0 %v127_v13  ;;  %724 = vmatpush3.msra.mxu1 %v127_v13 }
  0x26   :  { %666 = vmatprep.subr.mxu0 %v126_v14  ;;  %709 = vmatprep.subr.mxu1 %v126_v14 }
  0x27   :  { %667 = vmatpush3.msra.mxu0 %v126_v14  ;;  %725 = vmatpush3.msra.mxu1 %v126_v14 }
  0x28   :  { %668 = vmatprep.subr.mxu0 %v125_v15  ;;  %710 = vmatprep.subr.mxu1 %v125_v15 }
  0x29   :  { %669 = vmatpush3.msra.mxu0 %v125_v15  ;;  %726 = vmatpush3.msra.mxu1 %v125_v15 }
  0x2a   :  { %670 = vmatprep.subr.mxu0 %v124_v16  ;;  %711 = vmatprep.subr.mxu1 %v124_v16 }
  0x2b   :  { %671 = vmatpush3.msra.mxu0 %v124_v16  ;;  %727 = vmatpush3.msra.mxu1 %v124_v16 }
  0x2c   :  { %672 = vmatprep.mubr.f32.mxu0 %v108_v17  ;;  %684 = vmatprep.mubr.f32.mxu1 %v116_v18 }
  0x2d   :  { %673 = vmatmul.mubr.f32.vlgmr.msra.gmra.mxu0 %v109_v19  ;;  %685 = vmatmul.mubr.f32.vlgmr.msra.gmra.mxu1 %v117_v20 }
  0x2e   :  { %675 = vmatprep.mubr.f32.mxu0 %v110_v21  ;;  %687 = vmatprep.mubr.f32.mxu1 %v118_v22 }
  0x31   :  { %676 = vmatmul.mubr.f32.gmra.mxu0 %v111_v23  ;;  %688 = vmatmul.mubr.f32.gmra.mxu1 %v119_v24 }
  0x32   :  { %678 = vmatprep.mubr.f32.mxu0 %v112_v25  ;;  %690 = vmatprep.mubr.f32.mxu1 %v120_v26 }
  0x35   :  { %679 = vmatmul.mubr.f32.gmra.mxu0 %v113_v27  ;;  %691 = vmatmul.mubr.f32.gmra.mxu1 %v121_v28 }
  0x36   :  { %681 = vmatprep.mubr.f32.mxu0 %v114_v29  ;;  %693 = vmatprep.mubr.f32.mxu1 %v122_v30 }
  0x39   :  { %682 = vmatmul.mubr.f32.gmra.mxu0 %v115_v31  ;;  %694 = vmatmul.mubr.f32.gmra.mxu1 %v123_v32 }
  0xed   :  { %v674_v35 = vpop.f32.mrf.mxu0  ;;  %v686_v36 = vpop.f32.mrf.mxu1 }
  0xee   :  { %v286_v39 = vadd.f32 %v674_v35, %v93_v33  ;;  %v294_v40 = vadd.f32 %v686_v36, %v101_v34 }
  0xef   :  { %v206_v41 = vpop.f32.mrf.mxu0  ;;  %v246_v42 = vpop.f32.mrf.mxu1 }
  0xf0   :  { %302 = vst [vmem:[#allocation2] sm:$0xff] %v286_v39  ;;  %310 = vst [vmem:[#allocation2 + $0x20] sm:$0xff] %v294_v40  ;;  %v285_v45 = vadd.f32 %v206_v41, %v92_v37  ;;  %v293_v46 = vadd.f32 %v246_v42, %v100_v38 }
  0xf1   :  { %v677_v47 = vpop.f32.mrf.mxu0  ;;  %v689_v48 = vpop.f32.mrf.mxu1 }
  0xf2   :  { %301 = vst [vmem:[#allocation2 + $0x30] sm:$0xff] %v285_v45  ;;  %309 = vst [vmem:[#allocation2 + $0x40] sm:$0xff] %v293_v46  ;;  %v288_v51 = vadd.f32 %v677_v47, %v95_v43  ;;  %v296_v52 = vadd.f32 %v689_v48, %v103_v44 }
  0xf3   :  { %v216_v53 = vpop.f32.mrf.mxu0  ;;  %v256_v54 = vpop.f32.mrf.mxu1 }
  0xf4   :  { %304 = vst [vmem:[#allocation2 + $0x18] sm:$0xff] %v288_v51  ;;  %312 = vst [vmem:[#allocation2 + $0x38] sm:$0xff] %v296_v52  ;;  %v287_v57 = vadd.f32 %v216_v53, %v94_v49  ;;  %v295_v58 = vadd.f32 %v256_v54, %v102_v50 }
  0xf5   :  { %v680_v59 = vpop.f32.mrf.mxu0  ;;  %v692_v60 = vpop.f32.mrf.mxu1 }
  0xf6   :  { %303 = vst [vmem:[#allocation2 + $0x58] sm:$0xff] %v287_v57  ;;  %311 = vst [vmem:[#allocation2 + $0x10] sm:$0xff] %v295_v58  ;;  %v290_v63 = vadd.f32 %v680_v59, %v97_v55  ;;  %v298_v0 = vadd.f32 %v692_v60, %v105_v56 }
  0xf7   :  { %v226_v1 = vpop.f32.mrf.mxu0  ;;  %v266_v2 = vpop.f32.mrf.mxu1 }
  0xf8   :  { %306 = vst [vmem:[#allocation2 + $0x68] sm:$0xff] %v290_v63  ;;  %314 = vst [vmem:[#allocation2 + $0x70] sm:$0xff] %v298_v0  ;;  %v289_v5 = vadd.f32 %v226_v1, %v96_v61  ;;  %v297_v6 = vadd.f32 %v266_v2, %v104_v62 }
  0xf9   :  { %v683_v7 = vpop.f32.mrf.mxu0  ;;  %v695_v8 = vpop.f32.mrf.mxu1 }
  0xfa   :  { %305 = vst [vmem:[#allocation2 + $0x50] sm:$0xff] %v289_v5  ;;  %313 = vst [vmem:[#allocation2 + $0x60] sm:$0xff] %v297_v6  ;;  %v292_v11 = vadd.f32 %v683_v7, %v99_v3  ;;  %v300_v12 = vadd.f32 %v695_v8, %v107_v4 }
  0xfb   :  { %v236_v13 = vpop.f32.mrf.mxu0  ;;  %v276_v14 = vpop.f32.mrf.mxu1 }
  0xfc   :  { %308 = vst [vmem:[#allocation2 + $0x48] sm:$0xff] %v292_v11  ;;  %316 = vst [vmem:[#allocation2 + $0x28] sm:$0xff] %v300_v12  ;;  %v291_v15 = vadd.f32 %v236_v13, %v98_v9  ;;  %v299_v16 = vadd.f32 %v276_v14, %v106_v10 }
  0xfe   :  { %307 = vst [vmem:[#allocation2 + $0x8] sm:$0xff] %v291_v15  ;;  %315 = vst [vmem:[#allocation2 + $0x78] sm:$0xff] %v299_v16 }
  0xff PF:  { %v320_v17 = vld [vmem:[#allocation2 + $0x30] sm:$0xff]  ;;  %v607_v18 = vld [vmem:[%s1162_s4] ss:$0 sm:$0xff]  ;;  %v359_v19 = vlaneseq  ;;  %v322_v20 = vld [vmem:[#allocation2 + $0x58] sm:$0xff] }
 0x100   :  { %v885_v21 = vadd.f32 %v607_v18, %v320_v17  ;;  %v887_v22 = vadd.f32 %v607_v18, %v322_v20  ;;  %v321_v23 = vld [vmem:[#allocation2] sm:$0xff]  ;;  %v323_v24 = vld [vmem:[#allocation2 + $0x18] sm:$0xff]  ;;  %v325_v29 = vld [vmem:[#allocation2 + $0x68] sm:$0xff] }
 0x101   :  { %v889_v25 = vand.u32 127, %v359_v19  ;;  %v891_v26 = vadd.f32 %v607_v18, %v321_v23  ;;  %v893_v27 = vadd.f32 %v607_v18, %v323_v24  ;;  %v324_v28 = vld [vmem:[#allocation2 + $0x50] sm:$0xff]  ;;  %v910_v35 = vadd.f32 %v607_v18, %v325_v29  ;;  %v328_v42 = vld [vmem:[#allocation2 + $0x40] sm:$0xff]  ;;  %v331_v49 = vld [vmem:[#allocation2 + $0x38] sm:$0xff] }
 0x102   :  { %v908_v34 = vadd.f32 %v607_v18, %v324_v28  ;;  %v329_v43 = vld [vmem:[#allocation2 + $0x20] sm:$0xff]  ;;  %v928_v46 = vadd.f32 %v607_v18, %v328_v42  ;;  %v330_v48 = vld [vmem:[#allocation2 + $0x10] sm:$0xff]  ;;  %v944_v53 = vadd.f32 %v607_v18, %v331_v49 }
 0x103   :  { %vm361_vm0 = vcmp.lt.s32.totalorder %v889_v25, 4  ;;  %v327_v37 = vld [vmem:[#allocation2 + $0x48] sm:$0xff]  ;;  %v930_v47 = vadd.f32 %v607_v18, %v329_v43  ;;  %v942_v52 = vadd.f32 %v607_v18, %v330_v48  ;;  %v332_v54 = vld [vmem:[#allocation2 + $0x60] sm:$0xff]  ;;  %v333_v55 = vld [vmem:[#allocation2 + $0x70] sm:$0xff] }
 0x104   :  { %v362_v30 = vsel %vm361_vm0, %v885_v21, -1e+30  ;;  %v364_v31 = vsel %vm361_vm0, %v887_v22, -1e+30  ;;  %v363_v32 = vsel %vm361_vm0, %v891_v26, -1e+30  ;;  %v920_v41 = vadd.f32 %v607_v18, %v327_v37 }
 0x105   :  { %378 = vmax.xlane.f32.xlu0 %v362_v30  ;;  %382 = vmax.xlane.f32.xlu1 %v364_v31  ;;  %v365_v33 = vsel %vm361_vm0, %v893_v27, -1e+30  ;;  %v326_v36 = vld [vmem:[#allocation2 + $0x8] sm:$0xff]  ;;  %v366_v38 = vsel %vm361_vm0, %v908_v34, -1e+30  ;;  %v958_v58 = vadd.f32 %v607_v18, %v332_v54  ;;  %v960_v59 = vadd.f32 %v607_v18, %v333_v55  ;;  %v334_v60 = vld [vmem:[#allocation2 + $0x78] sm:$0xff] }
 0x106   :  { %v367_v39 = vsel %vm361_vm0, %v910_v35, -1e+30  ;;  %v918_v40 = vadd.f32 %v607_v18, %v326_v36  ;;  %v369_v45 = vsel %vm361_vm0, %v920_v41, -1e+30  ;;  %v935_v50 = vsel %vm361_vm0, %v928_v46, -1e+30 }
 0x107   :  { %v940_v51 = vsel %vm361_vm0, %v930_v47, -1e+30  ;;  %v951_v56 = vsel %vm361_vm0, %v942_v52, -1e+30  ;;  %v956_v57 = vsel %vm361_vm0, %v944_v53, -1e+30  ;;  %v974_v0 = vadd.f32 %v607_v18, %v334_v60 }
 0x108   :  { %v368_v44 = vsel %vm361_vm0, %v918_v40, -1e+30  ;;  %v335_v61 = vld [vmem:[#allocation2 + $0x28] sm:$0xff]  ;;  %v967_v62 = vsel %vm361_vm0, %v958_v58, -1e+30 }
 0x109   :  { %380 = vmax.xlane.f32.xlu0 %v363_v32  ;;  %384 = vmax.xlane.f32.xlu1 %v365_v33  ;;  %v972_v63 = vsel %vm361_vm0, %v960_v59, -1e+30  ;;  %v976_v1 = vadd.f32 %v607_v18, %v335_v61  ;;  %v983_v2 = vsel %vm361_vm0, %v974_v0, -1e+30 }
 0x10b   :  { %v988_v3 = vsel %vm361_vm0, %v976_v1, -1e+30 }
 0x10d   :  { %386 = vmax.xlane.f32.xlu0 %v366_v38  ;;  %388 = vmax.xlane.f32.xlu1 %v367_v39 }
 0x111   :  { %390 = vmax.xlane.f32.xlu0 %v368_v44  ;;  %392 = vmax.xlane.f32.xlu1 %v369_v45 }
 0x115   :  { %394 = vmax.xlane.f32.xlu0 %v935_v50  ;;  %396 = vmax.xlane.f32.xlu1 %v940_v51 }
 0x119   :  { %398 = vmax.xlane.f32.xlu0 %v951_v56  ;;  %400 = vmax.xlane.f32.xlu1 %v956_v57 }
 0x11d   :  { %402 = vmax.xlane.f32.xlu0 %v967_v62  ;;  %404 = vmax.xlane.f32.xlu1 %v972_v63 }
 0x121   :  { %406 = vmax.xlane.f32.xlu0 %v983_v2  ;;  %408 = vmax.xlane.f32.xlu1 %v988_v3 }
 0x18e   :  { %v992_v4 = vpop.xlane.xlu0 %378  ;;  %v994_v5 = vpop.xlane.xlu1 %382 }
 0x18f   :  { %v410_v6 = vsub.f32 %v362_v30, %v992_v4  ;;  %v412_v7 = vsub.f32 %v364_v31, %v994_v5 }
 0x191   :  { %v426_v8 = vmul.f32 1.442695, %v410_v6  ;;  %v430_v9 = vmul.f32 1.442695, %v412_v7 }
 0x192   :  { %v998_v10 = vpop.xlane.xlu0 %380  ;;  %v1000_v11 = vpop.xlane.xlu1 %384 }
 0x193   :  { %729 = vpow2.f32 %v426_v8  ;;  %v411_v12 = vsub.f32 %v363_v32, %v998_v10  ;;  %v413_v13 = vsub.f32 %v365_v33, %v1000_v11 }
 0x194   :  { %731 = vpow2.f32 %v430_v9 }
 0x195   :  { %v428_v14 = vmul.f32 1.442695, %v411_v12  ;;  %v432_v15 = vmul.f32 1.442695, %v413_v13 }
 0x196   :  { %v1004_v16 = vpop.xlane.xlu0 %386  ;;  %v1006_v17 = vpop.xlane.xlu1 %388 }
 0x197   :  { %733 = vpow2.f32 %v428_v14  ;;  %v414_v18 = vsub.f32 %v366_v38, %v1004_v16  ;;  %v415_v19 = vsub.f32 %v367_v39, %v1006_v17 }
 0x198   :  { %735 = vpow2.f32 %v432_v15 }
 0x199   :  { %v434_v20 = vmul.f32 1.442695, %v414_v18  ;;  %v436_v23 = vmul.f32 1.442695, %v415_v19 }
 0x19a   :  { %v1010_v24 = vpop.xlane.xlu0 %390  ;;  %v1012_v28 = vpop.xlane.xlu1 %392 }
 0x19b   :  { %737 = vpow2.f32 %v434_v20  ;;  %v416_v29 = vsub.f32 %v368_v44, %v1010_v24  ;;  %v417_v30 = vsub.f32 %v369_v45, %v1012_v28 }
 0x19c   :  { %739 = vpow2.f32 %v436_v23 }
 0x19d   :  { %v438_v31 = vmul.f32 1.442695, %v416_v29  ;;  %v440_v32 = vmul.f32 1.442695, %v417_v30 }
 0x19e   :  { %v1016_v33 = vpop.xlane.xlu0 %394  ;;  %v1018_v36 = vpop.xlane.xlu1 %396 }
 0x19f   :  { %741 = vpow2.f32 %v438_v31  ;;  %v418_v37 = vsub.f32 %v935_v50, %v1016_v33  ;;  %v419_v38 = vsub.f32 %v940_v51, %v1018_v36 }
 0x1a0   :  { %v730_v39 = vpop.eup %729  ;;  %743 = vpow2.f32 %v440_v32 }
 0x1a1   :  { %v732_v42 = vpop.eup %731  ;;  %v442_v43 = vmul.f32 1.442695, %v418_v37  ;;  %v444_v44 = vmul.f32 1.442695, %v419_v38  ;;  %v458_v45 = vsel %vm361_vm0, %v730_v39, 0.0 }
 0x1a2   :  { %474 = vadd.xlane.f32.xlu0 %v458_v45  ;;  %v1026_v48 = vpop.xlane.xlu0 %398  ;;  %v1028_v49 = vpop.xlane.xlu1 %400  ;;  %v460_v54 = vsel %vm361_vm0, %v732_v42, 0.0 }
 0x1a3   :  { %745 = vpow2.f32 %v442_v43  ;;  %v420_v50 = vsub.f32 %v951_v56, %v1026_v48  ;;  %v421_v51 = vsub.f32 %v956_v57, %v1028_v49 }
 0x1a4   :  { %v734_v55 = vpop.eup %733  ;;  %747 = vpow2.f32 %v444_v44 }
 0x1a5   :  { %v736_v60 = vpop.eup %735  ;;  %v446_v61 = vmul.f32 1.442695, %v420_v50  ;;  %v448_v6 = vmul.f32 1.442695, %v421_v51  ;;  %v459_v7 = vsel %vm361_vm0, %v734_v55, 0.0 }
 0x1a6   :  { %478 = vadd.xlane.f32.xlu0 %v460_v54  ;;  %476 = vadd.xlane.f32.xlu1 %v459_v7  ;;  %v1038_v8 = vpop.xlane.xlu0 %402  ;;  %v1040_v9 = vpop.xlane.xlu1 %404  ;;  %v461_v12 = vsel %vm361_vm0, %v736_v60, 0.0 }
 0x1a7   :  { %749 = vpow2.f32 %v446_v61  ;;  %v422_v56 = vsub.f32 %v967_v62, %v1038_v8  ;;  %v423_v57 = vsub.f32 %v972_v63, %v1040_v9 }
 0x1a8   :  { %v738_v13 = vpop.eup %737  ;;  %751 = vpow2.f32 %v448_v6 }
 0x1a9   :  { %v740_v14 = vpop.eup %739  ;;  %v450_v15 = vmul.f32 1.442695, %v422_v56  ;;  %v452_v18 = vmul.f32 1.442695, %v423_v57  ;;  %v462_v19 = vsel %vm361_vm0, %v738_v13, 0.0 }
 0x1aa   :  { %480 = vadd.xlane.f32.xlu1 %v461_v12  ;;  %482 = vadd.xlane.f32.xlu0 %v462_v19  ;;  %v1050_v20 = vpop.xlane.xlu0 %406  ;;  %v1052_v23 = vpop.xlane.xlu1 %408  ;;  %v463_v29 = vsel %vm361_vm0, %v740_v14, 0.0 }
 0x1ab   :  { %753 = vpow2.f32 %v450_v15  ;;  %v424_v62 = vsub.f32 %v983_v2, %v1050_v20  ;;  %v425_v63 = vsub.f32 %v988_v3, %v1052_v23 }
 0x1ac   :  { %v742_v30 = vpop.eup %741  ;;  %755 = vpow2.f32 %v452_v18 }
 0x1ad   :  { %v744_v31 = vpop.eup %743  ;;  %v454_v32 = vmul.f32 1.442695, %v424_v62  ;;  %v456_v37 = vmul.f32 1.442695, %v425_v63  ;;  %v464_v38 = vsel %vm361_vm0, %v742_v30, 0.0 }
 0x1ae   :  { %484 = vadd.xlane.f32.xlu1 %v463_v29  ;;  %486 = vadd.xlane.f32.xlu0 %v464_v38  ;;  %v465_v2 = vsel %vm361_vm0, %v744_v31, 0.0 }
 0x1af   :  { %757 = vpow2.f32 %v454_v32 }
 0x1b0   :  { %v746_v39 = vpop.eup %745  ;;  %759 = vpow2.f32 %v456_v37 }
 0x1b1   :  { %v748_v3 = vpop.eup %747  ;;  %v466_v42 = vsel %vm361_vm0, %v746_v39, 0.0 }
 0x1b2   :  { %488 = vadd.xlane.f32.xlu1 %v465_v2  ;;  %490 = vadd.xlane.f32.xlu0 %v466_v42  ;;  %v467_v43 = vsel %vm361_vm0, %v748_v3, 0.0 }
 0x1b4   :  { %v750_v44 = vpop.eup %749 }
 0x1b5   :  { %v752_v45 = vpop.eup %751  ;;  %v468_v50 = vsel %vm361_vm0, %v750_v44, 0.0 }
 0x1b6   :  { %492 = vadd.xlane.f32.xlu1 %v467_v43  ;;  %494 = vadd.xlane.f32.xlu0 %v468_v50  ;;  %v469_v51 = vsel %vm361_vm0, %v752_v45, 0.0 }
 0x1b8   :  { %v754_v54 = vpop.eup %753 }
 0x1b9   :  { %v756_v55 = vpop.eup %755  ;;  %v470_v60 = vsel %vm361_vm0, %v754_v54, 0.0 }
 0x1ba   :  { %496 = vadd.xlane.f32.xlu1 %v469_v51  ;;  %498 = vadd.xlane.f32.xlu0 %v470_v60  ;;  %v471_v61 = vsel %vm361_vm0, %v756_v55, 0.0 }
 0x1bc   :  { %v758_v6 = vpop.eup %757 }
 0x1bd   :  { %v760_v7 = vpop.eup %759  ;;  %v472_v56 = vsel %vm361_vm0, %v758_v6, 0.0 }
 0x1be   :  { %500 = vadd.xlane.f32.xlu1 %v471_v61  ;;  %502 = vadd.xlane.f32.xlu0 %v472_v56  ;;  %v473_v57 = vsel %vm361_vm0, %v760_v7, 0.0 }
 0x1c2   :  { %504 = vadd.xlane.f32.xlu1 %v473_v57 }
 0x22b   :  { %v475_v12 = vpop.xlane.xlu0 %474 }
 0x22c   :  { %761 = vlog2.f32 %v475_v12 }
 0x22f   :  { %v477_v13 = vpop.xlane.xlu1 %476  ;;  %v479_v14 = vpop.xlane.xlu0 %478 }
 0x230   :  { %763 = vlog2.f32 %v477_v13 }
 0x231   :  { %765 = vlog2.f32 %v479_v14 }
 0x233   :  { %v481_v15 = vpop.xlane.xlu1 %480  ;;  %v483_v18 = vpop.xlane.xlu0 %482 }
 0x234   :  { %767 = vlog2.f32 %v481_v15 }
 0x235   :  { %769 = vlog2.f32 %v483_v18 }
 0x237   :  { %v485_v19 = vpop.xlane.xlu1 %484  ;;  %v487_v62 = vpop.xlane.xlu0 %486 }
 0x238   :  { %771 = vlog2.f32 %v485_v19 }
 0x239   :  { %v762_v63 = vpop.eup %761  ;;  %773 = vlog2.f32 %v487_v62 }
 0x23a   :  { %v507_v29 = vmul.f32 0.6931472, %v762_v63 }
 0x23b   :  { %v489_v30 = vpop.xlane.xlu1 %488  ;;  %v491_v25 = vpop.xlane.xlu0 %490 }
 0x23c   :  { %v538_v31 = vadd.f32 %v507_v29, %v992_v4  ;;  %775 = vlog2.f32 %v489_v30 }
 0x23d   :  { %v764_v32 = vpop.eup %763  ;;  %777 = vlog2.f32 %v491_v25 }
 0x23e   :  { %v766_v37 = vpop.eup %765  ;;  %v554_v38 = vsub.f32 %v885_v21, %v538_v31  ;;  %v509_v2 = vmul.f32 0.6931472, %v764_v32 }
 0x23f   :  { %v511_v39 = vmul.f32 0.6931472, %v766_v37  ;;  %v493_v3 = vpop.xlane.xlu1 %492  ;;  %v495_v42 = vpop.xlane.xlu0 %494 }
 0x240   :  { %570 = vst [vmem:[%s1163_s5] sm:$0xff] %v554_v38  ;;  %v539_v43 = vadd.f32 %v509_v2, %v998_v10  ;;  %779 = vlog2.f32 %v493_v3 }
 0x241   :  { %v768_v44 = vpop.eup %767  ;;  %v540_v4 = vadd.f32 %v511_v39, %v994_v5  ;;  %781 = vlog2.f32 %v495_v42 }
 0x242   :  { %v770_v45 = vpop.eup %769  ;;  %v555_v50 = vsub.f32 %v891_v26, %v539_v43  ;;  %v513_v51 = vmul.f32 0.6931472, %v768_v44 }
 0x243   :  { %v556_v21 = vsub.f32 %v887_v22, %v540_v4  ;;  %v515_v54 = vmul.f32 0.6931472, %v770_v45  ;;  %v497_v55 = vpop.xlane.xlu1 %496  ;;  %v499_v60 = vpop.xlane.xlu0 %498 }
 0x244   :  { %571 = vst [vmem:[%s1163_s5 + $0x8] sm:$0xff] %v555_v50  ;;  %v541_v10 = vadd.f32 %v513_v51, %v1000_v11  ;;  %783 = vlog2.f32 %v497_v55 }
 0x245   :  { %v772_v61 = vpop.eup %771  ;;  %572 = vst [vmem:[%s1163_s5 + $0x10] sm:$0xff] %v556_v21  ;;  %v542_v26 = vadd.f32 %v515_v54, %v1004_v16  ;;  %785 = vlog2.f32 %v499_v60 }
 0x246   :  { %v774_v5 = vpop.eup %773  ;;  %v557_v22 = vsub.f32 %v893_v27, %v541_v10  ;;  %v517_v6 = vmul.f32 0.6931472, %v772_v61 }
 0x247   :  { %v558_v7 = vsub.f32 %v908_v34, %v542_v26  ;;  %v519_v56 = vmul.f32 0.6931472, %v774_v5  ;;  %v501_v57 = vpop.xlane.xlu1 %500  ;;  %v503_v12 = vpop.xlane.xlu0 %502 }
 0x248   :  { %573 = vst [vmem:[%s1163_s5 + $0x18] sm:$0xff] %v557_v22  ;;  %v543_v11 = vadd.f32 %v517_v6, %v1006_v17  ;;  %787 = vlog2.f32 %v501_v57 }
 0x249   :  { %v776_v13 = vpop.eup %775  ;;  %574 = vst [vmem:[%s1163_s5 + $0x20] sm:$0xff] %v558_v7  ;;  %v544_v27 = vadd.f32 %v519_v56, %v1010_v24  ;;  %789 = vlog2.f32 %v503_v12 }
 0x24a   :  { %v778_v16 = vpop.eup %777  ;;  %v559_v34 = vsub.f32 %v910_v35, %v543_v11  ;;  %v521_v14 = vmul.f32 0.6931472, %v776_v13 }
 0x24b   :  { %v560_v15 = vsub.f32 %v918_v40, %v544_v27  ;;  %v523_v18 = vmul.f32 0.6931472, %v778_v16  ;;  %v505_v19 = vpop.xlane.xlu1 %504 }
 0x24c   :  { %575 = vst [vmem:[%s1163_s5 + $0x28] sm:$0xff] %v559_v34  ;;  %v545_v17 = vadd.f32 %v521_v14, %v1012_v28  ;;  %791 = vlog2.f32 %v505_v19 }
 0x24d   :  { %v780_v62 = vpop.eup %779  ;;  %576 = vst [vmem:[%s1163_s5 + $0x30] sm:$0xff] %v560_v15  ;;  %v546_v24 = vadd.f32 %v523_v18, %v1016_v33 }
 0x24e   :  { %v782_v35 = vpop.eup %781  ;;  %v561_v63 = vsub.f32 %v920_v41, %v545_v17  ;;  %v525_v40 = vmul.f32 0.6931472, %v780_v62 }
 0x24f   :  { %v562_v29 = vsub.f32 %v928_v46, %v546_v24  ;;  %v527_v30 = vmul.f32 0.6931472, %v782_v35 }
 0x250   :  { %577 = vst [vmem:[%s1163_s5 + $0x38] sm:$0xff] %v561_v63  ;;  %v547_v28 = vadd.f32 %v525_v40, %v1018_v36 }
 0x251   :  { %v784_v25 = vpop.eup %783  ;;  %578 = vst [vmem:[%s1163_s5 + $0x40] sm:$0xff] %v562_v29  ;;  %v548_v33 = vadd.f32 %v527_v30, %v1026_v48 }
 0x252   :  { %v786_v31 = vpop.eup %785  ;;  %v563_v41 = vsub.f32 %v930_v47, %v547_v28  ;;  %v529_v32 = vmul.f32 0.6931472, %v784_v25 }
 0x253   :  { %v564_v46 = vsub.f32 %v942_v52, %v548_v33  ;;  %v531_v37 = vmul.f32 0.6931472, %v786_v31 }
 0x254   :  { %579 = vst [vmem:[%s1163_s5 + $0x48] sm:$0xff] %v563_v41  ;;  %v549_v36 = vadd.f32 %v529_v32, %v1028_v49 }
 0x255   :  { %v788_v38 = vpop.eup %787  ;;  %580 = vst [vmem:[%s1163_s5 + $0x50] sm:$0xff] %v564_v46  ;;  %v550_v48 = vadd.f32 %v531_v37, %v1038_v8 }
 0x256   :  { %v790_v2 = vpop.eup %789  ;;  %v565_v47 = vsub.f32 %v944_v53, %v549_v36  ;;  %v533_v39 = vmul.f32 0.6931472, %v788_v38 }
 0x257   :  { %v566_v52 = vsub.f32 %v958_v58, %v550_v48  ;;  %v535_v3 = vmul.f32 0.6931472, %v790_v2 }
 0x258   :  { %581 = vst [vmem:[%s1163_s5 + $0x58] sm:$0xff] %v565_v47  ;;  %v551_v49 = vadd.f32 %v533_v39, %v1040_v9 }
 0x259   :  { %v792_v42 = vpop.eup %791  ;;  %582 = vst [vmem:[%s1163_s5 + $0x60] sm:$0xff] %v566_v52  ;;  %v552_v8 = vadd.f32 %v535_v3, %v1050_v20 }
 0x25a   :  { %v567_v43 = vsub.f32 %v960_v59, %v551_v49  ;;  %v537_v53 = vmul.f32 0.6931472, %v792_v42 }
 0x25b   :  { %v568_v44 = vsub.f32 %v974_v0, %v552_v8 }
 0x25c   :  { %583 = vst [vmem:[%s1163_s5 + $0x68] sm:$0xff] %v567_v43  ;;  %v553_v58 = vadd.f32 %v537_v53, %v1052_v23 }
 0x25d   :  { %584 = vst [vmem:[%s1163_s5 + $0x70] sm:$0xff] %v568_v44 }
 0x25e   :  { %v569_v9 = vsub.f32 %v976_v1, %v553_v58 }
 0x260   :  { %585 = vst [vmem:[%s1163_s5 + $0x78] sm:$0xff] %v569_v9 }

// kernel: gkan_forward.2
= control target key start
LH: loop header
LB: loop body
LE: loop exit
PB: predicated region body
PF: predicated region fallthrough
CT: control target
= control target key end

     0   :  { %v818_v0 = vmov 0.0   ;;  %s1029_s0 = inlined_call_operand.<no memory space> [shape: s32[1], index: 0, kind: input, shape index: {}]   ;;  %s1030_s1 = inlined_call_operand.<no memory space> [shape: s32[1], index: 1, kind: input, shape index: {}]   ;;  %s1031_s4 = inlined_call_operand.vmem [shape: f32[1,128], index: 4, kind: input, shape index: {}]   ;;  %s1032_s5 = inlined_call_operand.vmem [shape: f32[128,128], index: 5, kind: input, shape index: {}]   ;;  %s1033_s6 = inlined_call_operand.vmem [shape: f32[128,128], index: 6, kind: output, shape index: {}]   ;;  %s1034_s2 = inlined_call_operand.vmem [shape: f32[128,128], index: 2, kind: input, shape index: {}]   ;;  %s1035_s3 = inlined_call_operand.vmem [shape: f32[128,128], index: 3, kind: input, shape index: {}]  }
   0x1   :  { %p54_p0 = scmp.lt.s32.totalorder %s1029_s0, 0  ;;  %s572_s25 = sshll.u32 %s1029_s0, 4  ;;  %74 = vst [vmem:[#allocation2 + $0x30] sm:$0xff] %v818_v0  ;;  %75 = vst [vmem:[#allocation2] sm:$0xff] %v818_v0 }
   0x2   :  { %76 = vst [vmem:[#allocation2 + $0x58] sm:$0xff] %v818_v0  ;;  %77 = vst [vmem:[#allocation2 + $0x18] sm:$0xff] %v818_v0  ;;  %p63_p1 = scmp.lt.s32.totalorder %s572_s25, 15  ;;  %p575_p2 = scmp.le.s32.totalorder %s1030_s1, 0 }
   0x3   :  { %78 = vst [vmem:[#allocation2 + $0x50] sm:$0xff] %v818_v0  ;;  %79 = vst [vmem:[#allocation2 + $0x68] sm:$0xff] %v818_v0  ;;  %s1037_s0 = smov (!%p54_p0, %s1029_s0), 0 }
   0x4   :  { %80 = vst [vmem:[#allocation2 + $0x8] sm:$0xff] %v818_v0  ;;  %81 = vst [vmem:[#allocation2 + $0x48] sm:$0xff] %v818_v0  ;;  %s1039_s25 = smov (!%p63_p1, %s572_s25), 15  ;;  %s571_s30 = sshll.u32 %s1037_s0, 3 }
   0x5   :  { %82 = vst [vmem:[#allocation2 + $0x40] sm:$0xff] %v818_v0  ;;  %83 = vst [vmem:[#allocation2 + $0x20] sm:$0xff] %v818_v0  ;;  %s870_s9 = scalar_lea.vmem %s1034_s2, %s571_s30  ;;  %s573_s10 = sshll.u32 %s1039_s25, 3 }
   0x6   :  { %84 = vst [vmem:[#allocation2 + $0x10] sm:$0xff] %v818_v0  ;;  %85 = vst [vmem:[#allocation2 + $0x38] sm:$0xff] %v818_v0  ;;  %s875_s13 = scalar_lea.vmem %s1035_s3, %s573_s10  ;;  %94 = sbr.rel (%p575_p2) target bundleno = 255 (0xff), region = 25 }
   0x7   :  { %86 = vst [vmem:[#allocation2 + $0x60] sm:$0xff] %v818_v0  ;;  %87 = vst [vmem:[#allocation2 + $0x70] sm:$0xff] %v818_v0 }
   0x8   :  { %88 = vst [vmem:[#allocation2 + $0x78] sm:$0xff] %v818_v0  ;;  %89 = vst [vmem:[#allocation2 + $0x28] sm:$0xff] %v818_v0 }
   0xb   :  { %v142_v1 = vld [vmem:[%s875_s13 + $0x78] sm:$0xff]  ;;  %v141_v2 = vld [vmem:[%s875_s13 + $0x70] sm:$0xff]  ;;  %v140_v3 = vld [vmem:[%s875_s13 + $0x68] sm:$0xff] }
   0xc   :  { %641 = vmatprep.subr.mxu0 %v142_v1  ;;  %753 = vmatprep.subr.mxu1 %v142_v1  ;;  %v139_v4 = vld [vmem:[%s875_s13 + $0x60] sm:$0xff]  ;;  %v138_v5 = vld [vmem:[%s875_s13 + $0x58] sm:$0xff]  ;;  %v137_v6 = vld [vmem:[%s875_s13 + $0x50] sm:$0xff] }
   0xd   :  { %642 = vmatpush3.msra.mxu0 %v142_v1  ;;  %769 = vmatpush3.msra.mxu1 %v142_v1  ;;  %v136_v7 = vld [vmem:[%s875_s13 + $0x48] sm:$0xff]  ;;  %v135_v8 = vld [vmem:[%s875_s13 + $0x40] sm:$0xff]  ;;  %v134_v9 = vld [vmem:[%s875_s13 + $0x38] sm:$0xff] }
   0xe   :  { %643 = vmatprep.subr.mxu0 %v141_v2  ;;  %754 = vmatprep.subr.mxu1 %v141_v2  ;;  %v133_v10 = vld [vmem:[%s875_s13 + $0x30] sm:$0xff]  ;;  %v132_v11 = vld [vmem:[%s875_s13 + $0x28] sm:$0xff]  ;;  %v131_v12 = vld [vmem:[%s875_s13 + $0x20] sm:$0xff] }
   0xf   :  { %644 = vmatpush3.msra.mxu0 %v141_v2  ;;  %770 = vmatpush3.msra.mxu1 %v141_v2  ;;  %v130_v13 = vld [vmem:[%s875_s13 + $0x18] sm:$0xff]  ;;  %v129_v14 = vld [vmem:[%s875_s13 + $0x10] sm:$0xff]  ;;  %v128_v15 = vld [vmem:[%s875_s13 + $0x8] sm:$0xff] }
  0x10   :  { %645 = vmatprep.subr.mxu0 %v140_v3  ;;  %755 = vmatprep.subr.mxu1 %v140_v3  ;;  %v127_v16 = vld [vmem:[%s875_s13] sm:$0xff]  ;;  %v112_v19 = vld [vmem:[%s870_s9 + $0x8] sm:$0xff]  ;;  %v113_v21 = vld [vmem:[%s870_s9 + $0x10] sm:$0xff] }
  0x11   :  { %646 = vmatpush3.msra.mxu0 %v140_v3  ;;  %771 = vmatpush3.msra.mxu1 %v140_v3  ;;  %v111_v17 = vld [vmem:[%s870_s9] sm:$0xff]  ;;  %v120_v20 = vld [vmem:[%s870_s9 + $0x48] sm:$0xff]  ;;  %v121_v22 = vld [vmem:[%s870_s9 + $0x50] sm:$0xff] }
  0x12   :  { %647 = vmatprep.subr.mxu0 %v139_v4  ;;  %756 = vmatprep.subr.mxu1 %v139_v4  ;;  %v119_v18 = vld [vmem:[%s870_s9 + $0x40] sm:$0xff]  ;;  %v114_v23 = vld [vmem:[%s870_s9 + $0x18] sm:$0xff]  ;;  %v116_v27 = vld [vmem:[%s870_s9 + $0x28] sm:$0xff] }
  0x13   :  { %648 = vmatpush3.msra.mxu0 %v139_v4  ;;  %772 = vmatpush3.msra.mxu1 %v139_v4  ;;  %v122_v24 = vld [vmem:[%s870_s9 + $0x58] sm:$0xff]  ;;  %v115_v25 = vld [vmem:[%s870_s9 + $0x20] sm:$0xff]  ;;  %v124_v28 = vld [vmem:[%s870_s9 + $0x68] sm:$0xff] }
  0x14   :  { %649 = vmatprep.subr.mxu0 %v138_v5  ;;  %757 = vmatprep.subr.mxu1 %v138_v5  ;;  %v123_v26 = vld [vmem:[%s870_s9 + $0x60] sm:$0xff]  ;;  %v117_v29 = vld [vmem:[%s870_s9 + $0x30] sm:$0xff]  ;;  %v118_v31 = vld [vmem:[%s870_s9 + $0x38] sm:$0xff] }
  0x15   :  { %650 = vmatpush3.msra.mxu0 %v138_v5  ;;  %773 = vmatpush3.msra.mxu1 %v138_v5  ;;  %v125_v30 = vld [vmem:[%s870_s9 + $0x70] sm:$0xff]  ;;  %v126_v32 = vld [vmem:[%s870_s9 + $0x78] sm:$0xff]  ;;  %v96_v33 = vld [vmem:[#allocation2] sm:$0xff] }
  0x16   :  { %651 = vmatprep.subr.mxu0 %v137_v6  ;;  %758 = vmatprep.subr.mxu1 %v137_v6  ;;  %v104_v34 = vld [vmem:[#allocation2 + $0x20] sm:$0xff]  ;;  %v95_v37 = vld [vmem:[#allocation2 + $0x30] sm:$0xff]  ;;  %v98_v43 = vld [vmem:[#allocation2 + $0x18] sm:$0xff] }
  0x17   :  { %652 = vmatpush3.msra.mxu0 %v137_v6  ;;  %774 = vmatpush3.msra.mxu1 %v137_v6  ;;  %v103_v38 = vld [vmem:[#allocation2 + $0x40] sm:$0xff]  ;;  %v106_v44 = vld [vmem:[#allocation2 + $0x38] sm:$0xff]  ;;  %v105_v50 = vld [vmem:[#allocation2 + $0x10] sm:$0xff] }
  0x18   :  { %653 = vmatprep.subr.mxu0 %v136_v7  ;;  %759 = vmatprep.subr.mxu1 %v136_v7  ;;  %v97_v49 = vld [vmem:[#allocation2 + $0x58] sm:$0xff]  ;;  %v100_v55 = vld [vmem:[#allocation2 + $0x68] sm:$0xff]  ;;  %v108_v56 = vld [vmem:[#allocation2 + $0x70] sm:$0xff] }
  0x19   :  { %654 = vmatpush3.msra.mxu0 %v136_v7  ;;  %775 = vmatpush3.msra.mxu1 %v136_v7  ;;  %v99_v61 = vld [vmem:[#allocation2 + $0x50] sm:$0xff]  ;;  %v107_v62 = vld [vmem:[#allocation2 + $0x60] sm:$0xff]  ;;  %v102_v3 = vld [vmem:[#allocation2 + $0x48] sm:$0xff] }
  0x1a   :  { %655 = vmatprep.subr.mxu0 %v135_v8  ;;  %760 = vmatprep.subr.mxu1 %v135_v8  ;;  %v110_v4 = vld [vmem:[#allocation2 + $0x28] sm:$0xff] }
  0x1b   :  { %656 = vmatpush3.msra.mxu0 %v135_v8  ;;  %776 = vmatpush3.msra.mxu1 %v135_v8 }
  0x1c   :  { %657 = vmatprep.subr.mxu0 %v134_v9  ;;  %761 = vmatprep.subr.mxu1 %v134_v9 }
  0x1d   :  { %658 = vmatpush3.msra.mxu0 %v134_v9  ;;  %777 = vmatpush3.msra.mxu1 %v134_v9  ;;  %v101_v9 = vld [vmem:[#allocation2 + $0x8] sm:$0xff] }
  0x1e   :  { %659 = vmatprep.subr.mxu0 %v133_v10  ;;  %762 = vmatprep.subr.mxu1 %v133_v10 }
  0x1f   :  { %660 = vmatpush3.msra.mxu0 %v133_v10  ;;  %778 = vmatpush3.msra.mxu1 %v133_v10  ;;  %v109_v10 = vld [vmem:[#allocation2 + $0x78] sm:$0xff] }
  0x20   :  { %661 = vmatprep.subr.mxu0 %v132_v11  ;;  %763 = vmatprep.subr.mxu1 %v132_v11 }
  0x21   :  { %662 = vmatpush3.msra.mxu0 %v132_v11  ;;  %779 = vmatpush3.msra.mxu1 %v132_v11 }
  0x22   :  { %663 = vmatprep.subr.mxu0 %v131_v12  ;;  %764 = vmatprep.subr.mxu1 %v131_v12 }
  0x23   :  { %664 = vmatpush3.msra.mxu0 %v131_v12  ;;  %780 = vmatpush3.msra.mxu1 %v131_v12 }
  0x24   :  { %665 = vmatprep.subr.mxu0 %v130_v13  ;;  %765 = vmatprep.subr.mxu1 %v130_v13 }
  0x25   :  { %666 = vmatpush3.msra.mxu0 %v130_v13  ;;  %781 = vmatpush3.msra.mxu1 %v130_v13 }
  0x26   :  { %667 = vmatprep.subr.mxu0 %v129_v14  ;;  %766 = vmatprep.subr.mxu1 %v129_v14 }
  0x27   :  { %668 = vmatpush3.msra.mxu0 %v129_v14  ;;  %782 = vmatpush3.msra.mxu1 %v129_v14 }
  0x28   :  { %669 = vmatprep.subr.mxu0 %v128_v15  ;;  %767 = vmatprep.subr.mxu1 %v128_v15 }
  0x29   :  { %670 = vmatpush3.msra.mxu0 %v128_v15  ;;  %783 = vmatpush3.msra.mxu1 %v128_v15 }
  0x2a   :  { %671 = vmatprep.subr.mxu0 %v127_v16  ;;  %768 = vmatprep.subr.mxu1 %v127_v16 }
  0x2b   :  { %672 = vmatpush3.msra.mxu0 %v127_v16  ;;  %784 = vmatpush3.msra.mxu1 %v127_v16 }
  0x2c   :  { %673 = vmatprep.mubr.f32.mxu0 %v111_v17  ;;  %685 = vmatprep.mubr.f32.mxu1 %v119_v18 }
  0x2d   :  { %674 = vmatmul.mubr.f32.vlgmr.msra.gmra.mxu0 %v112_v19  ;;  %686 = vmatmul.mubr.f32.vlgmr.msra.gmra.mxu1 %v120_v20 }
  0x2e   :  { %676 = vmatprep.mubr.f32.mxu0 %v113_v21  ;;  %688 = vmatprep.mubr.f32.mxu1 %v121_v22 }
  0x31   :  { %677 = vmatmul.mubr.f32.gmra.mxu0 %v114_v23  ;;  %689 = vmatmul.mubr.f32.gmra.mxu1 %v122_v24 }
  0x32   :  { %679 = vmatprep.mubr.f32.mxu0 %v115_v25  ;;  %691 = vmatprep.mubr.f32.mxu1 %v123_v26 }
  0x35   :  { %680 = vmatmul.mubr.f32.gmra.mxu0 %v116_v27  ;;  %692 = vmatmul.mubr.f32.gmra.mxu1 %v124_v28 }
  0x36   :  { %682 = vmatprep.mubr.f32.mxu0 %v117_v29  ;;  %694 = vmatprep.mubr.f32.mxu1 %v125_v30 }
  0x39   :  { %683 = vmatmul.mubr.f32.gmra.mxu0 %v118_v31  ;;  %695 = vmatmul.mubr.f32.gmra.mxu1 %v126_v32 }
  0xed   :  { %v675_v35 = vpop.f32.mrf.mxu0  ;;  %v687_v36 = vpop.f32.mrf.mxu1 }
  0xee   :  { %v289_v39 = vadd.f32 %v675_v35, %v96_v33  ;;  %v297_v40 = vadd.f32 %v687_v36, %v104_v34 }
  0xef   :  { %v209_v41 = vpop.f32.mrf.mxu0  ;;  %v249_v42 = vpop.f32.mrf.mxu1 }
  0xf0   :  { %305 = vst [vmem:[#allocation2] sm:$0xff] %v289_v39  ;;  %313 = vst [vmem:[#allocation2 + $0x20] sm:$0xff] %v297_v40  ;;  %v288_v45 = vadd.f32 %v209_v41, %v95_v37  ;;  %v296_v46 = vadd.f32 %v249_v42, %v103_v38 }
  0xf1   :  { %v678_v47 = vpop.f32.mrf.mxu0  ;;  %v690_v48 = vpop.f32.mrf.mxu1 }
  0xf2   :  { %304 = vst [vmem:[#allocation2 + $0x30] sm:$0xff] %v288_v45  ;;  %312 = vst [vmem:[#allocation2 + $0x40] sm:$0xff] %v296_v46  ;;  %v291_v51 = vadd.f32 %v678_v47, %v98_v43  ;;  %v299_v52 = vadd.f32 %v690_v48, %v106_v44 }
  0xf3   :  { %v219_v53 = vpop.f32.mrf.mxu0  ;;  %v259_v54 = vpop.f32.mrf.mxu1 }
  0xf4   :  { %307 = vst [vmem:[#allocation2 + $0x18] sm:$0xff] %v291_v51  ;;  %315 = vst [vmem:[#allocation2 + $0x38] sm:$0xff] %v299_v52  ;;  %v290_v57 = vadd.f32 %v219_v53, %v97_v49  ;;  %v298_v58 = vadd.f32 %v259_v54, %v105_v50 }
  0xf5   :  { %v681_v59 = vpop.f32.mrf.mxu0  ;;  %v693_v60 = vpop.f32.mrf.mxu1 }
  0xf6   :  { %306 = vst [vmem:[#allocation2 + $0x58] sm:$0xff] %v290_v57  ;;  %314 = vst [vmem:[#allocation2 + $0x10] sm:$0xff] %v298_v58  ;;  %v293_v63 = vadd.f32 %v681_v59, %v100_v55  ;;  %v301_v0 = vadd.f32 %v693_v60, %v108_v56 }
  0xf7   :  { %v229_v1 = vpop.f32.mrf.mxu0  ;;  %v269_v2 = vpop.f32.mrf.mxu1 }
  0xf8   :  { %309 = vst [vmem:[#allocation2 + $0x68] sm:$0xff] %v293_v63  ;;  %317 = vst [vmem:[#allocation2 + $0x70] sm:$0xff] %v301_v0  ;;  %v292_v5 = vadd.f32 %v229_v1, %v99_v61  ;;  %v300_v6 = vadd.f32 %v269_v2, %v107_v62 }
  0xf9   :  { %v684_v7 = vpop.f32.mrf.mxu0  ;;  %v696_v8 = vpop.f32.mrf.mxu1 }
  0xfa   :  { %308 = vst [vmem:[#allocation2 + $0x50] sm:$0xff] %v292_v5  ;;  %316 = vst [vmem:[#allocation2 + $0x60] sm:$0xff] %v300_v6  ;;  %v295_v11 = vadd.f32 %v684_v7, %v102_v3  ;;  %v303_v12 = vadd.f32 %v696_v8, %v110_v4 }
  0xfb   :  { %v239_v13 = vpop.f32.mrf.mxu0  ;;  %v279_v14 = vpop.f32.mrf.mxu1 }
  0xfc   :  { %311 = vst [vmem:[#allocation2 + $0x48] sm:$0xff] %v295_v11  ;;  %319 = vst [vmem:[#allocation2 + $0x28] sm:$0xff] %v303_v12  ;;  %v294_v15 = vadd.f32 %v239_v13, %v101_v9  ;;  %v302_v16 = vadd.f32 %v279_v14, %v109_v10 }
  0xfe   :  { %310 = vst [vmem:[#allocation2 + $0x8] sm:$0xff] %v294_v15  ;;  %318 = vst [vmem:[#allocation2 + $0x78] sm:$0xff] %v302_v16 }
  0xff PF:  { %v393_v17 = vld [vmem:[%s1032_s5 + $0x78] sm:$0xff]  ;;  %v392_v18 = vld [vmem:[%s1032_s5 + $0x70] sm:$0xff]  ;;  %v391_v19 = vld [vmem:[%s1032_s5 + $0x68] sm:$0xff] }
 0x100   :  { %697 = vmatprep.subr.mxu0 %v393_v17  ;;  %785 = vmatprep.subr.mxu1 %v393_v17  ;;  %v390_v20 = vld [vmem:[%s1032_s5 + $0x60] sm:$0xff]  ;;  %v389_v21 = vld [vmem:[%s1032_s5 + $0x58] sm:$0xff]  ;;  %v388_v22 = vld [vmem:[%s1032_s5 + $0x50] sm:$0xff] }
 0x101   :  { %698 = vmatpush3.msra.mxu0 %v393_v17  ;;  %801 = vmatpush3.msra.mxu1 %v393_v17  ;;  %v387_v23 = vld [vmem:[%s1032_s5 + $0x48] sm:$0xff]  ;;  %v386_v24 = vld [vmem:[%s1032_s5 + $0x40] sm:$0xff]  ;;  %v385_v25 = vld [vmem:[%s1032_s5 + $0x38] sm:$0xff] }
 0x102   :  { %699 = vmatprep.subr.mxu0 %v392_v18  ;;  %786 = vmatprep.subr.mxu1 %v392_v18  ;;  %v384_v26 = vld [vmem:[%s1032_s5 + $0x30] sm:$0xff]  ;;  %v383_v27 = vld [vmem:[%s1032_s5 + $0x28] sm:$0xff]  ;;  %v382_v28 = vld [vmem:[%s1032_s5 + $0x20] sm:$0xff] }
 0x103   :  { %700 = vmatpush3.msra.mxu0 %v392_v18  ;;  %802 = vmatpush3.msra.mxu1 %v392_v18  ;;  %v381_v29 = vld [vmem:[%s1032_s5 + $0x18] sm:$0xff]  ;;  %v323_v30 = vld [vmem:[#allocation2 + $0x30] sm:$0xff]  ;;  %v954_v31 = vld [vmem:[%s1031_s4] ss:$0 sm:$0xff] }
 0x104   :  { %701 = vmatprep.subr.mxu0 %v391_v19  ;;  %787 = vmatprep.subr.mxu1 %v391_v19  ;;  %v331_v32 = vld [vmem:[#allocation2 + $0x40] sm:$0xff]  ;;  %v380_v35 = vld [vmem:[%s1032_s5 + $0x10] sm:$0xff]  ;;  %v325_v36 = vld [vmem:[#allocation2 + $0x58] sm:$0xff]  ;;  %v346_v38 = vadd.f32 %v954_v31, %v323_v30 }
 0x105   :  { %702 = vmatpush3.msra.mxu0 %v391_v19  ;;  %803 = vmatpush3.msra.mxu1 %v391_v19  ;;  %v324_v33 = vld [vmem:[#allocation2] sm:$0xff]  ;;  %v333_v37 = vld [vmem:[#allocation2 + $0x10] sm:$0xff]  ;;  %v354_v39 = vadd.f32 %v954_v31, %v331_v32  ;;  %v379_v40 = vld [vmem:[%s1032_s5 + $0x8] sm:$0xff]  ;;  %v348_v43 = vadd.f32 %v954_v31, %v325_v36 }
 0x106   :  { %703 = vmatprep.subr.mxu0 %v390_v20  ;;  %788 = vmatprep.subr.mxu1 %v390_v20  ;;  %v332_v34 = vld [vmem:[#allocation2 + $0x20] sm:$0xff]  ;;  %v347_v41 = vadd.f32 %v954_v31, %v324_v33  ;;  %v356_v44 = vadd.f32 %v954_v31, %v333_v37  ;;  %v326_v45 = vld [vmem:[#allocation2 + $0x18] sm:$0xff]  ;;  %v327_v48 = vld [vmem:[#allocation2 + $0x50] sm:$0xff]  ;;  %v362_v50 = vmax.f32 %v346_v38, 0.0 }
 0x107   :  { %704 = vmatpush3.msra.mxu0 %v390_v20  ;;  %804 = vmatpush3.msra.mxu1 %v390_v20  ;;  %v355_v42 = vadd.f32 %v954_v31, %v332_v34  ;;  %v334_v46 = vld [vmem:[#allocation2 + $0x38] sm:$0xff]  ;;  %v378_v47 = vld [vmem:[%s1032_s5] sm:$0xff]  ;;  %v370_v51 = vmax.f32 %v354_v39, 0.0  ;;  %v349_v54 = vadd.f32 %v954_v31, %v326_v45  ;;  %v364_v56 = vmax.f32 %v348_v43, 0.0  ;;  %v328_v60 = vld [vmem:[#allocation2 + $0x68] sm:$0xff] }
 0x108   :  { %705 = vmatprep.subr.mxu0 %v389_v21  ;;  %789 = vmatprep.subr.mxu1 %v389_v21  ;;  %v335_v49 = vld [vmem:[#allocation2 + $0x60] sm:$0xff]  ;;  %v363_v52 = vmax.f32 %v347_v41, 0.0  ;;  %v357_v55 = vadd.f32 %v954_v31, %v334_v46  ;;  %v372_v57 = vmax.f32 %v356_v44, 0.0  ;;  %v350_v58 = vadd.f32 %v954_v31, %v327_v48  ;;  %v336_v61 = vld [vmem:[#allocation2 + $0x70] sm:$0xff]  ;;  %v329_v62 = vld [vmem:[#allocation2 + $0x8] sm:$0xff] }
 0x109   :  { %706 = vmatpush3.msra.mxu0 %v389_v21  ;;  %805 = vmatpush3.msra.mxu1 %v389_v21  ;;  %v371_v53 = vmax.f32 %v355_v42, 0.0  ;;  %v358_v59 = vadd.f32 %v954_v31, %v335_v49  ;;  %v337_v63 = vld [vmem:[#allocation2 + $0x78] sm:$0xff]  ;;  %v365_v0 = vmax.f32 %v349_v54, 0.0  ;;  %v351_v2 = vadd.f32 %v954_v31, %v328_v60  ;;  %v330_v8 = vld [vmem:[#allocation2 + $0x48] sm:$0xff] }
 0x10a   :  { %707 = vmatprep.subr.mxu0 %v388_v22  ;;  %790 = vmatprep.subr.mxu1 %v388_v22  ;;  %v373_v1 = vmax.f32 %v357_v55, 0.0  ;;  %v359_v3 = vadd.f32 %v954_v31, %v336_v61  ;;  %v366_v4 = vmax.f32 %v350_v58, 0.0  ;;  %v352_v6 = vadd.f32 %v954_v31, %v329_v62  ;;  %v338_v9 = vld [vmem:[#allocation2 + $0x28] sm:$0xff] }
 0x10b   :  { %708 = vmatpush3.msra.mxu0 %v388_v22  ;;  %806 = vmatpush3.msra.mxu1 %v388_v22  ;;  %v374_v5 = vmax.f32 %v358_v59, 0.0  ;;  %v360_v7 = vadd.f32 %v954_v31, %v337_v63  ;;  %v367_v10 = vmax.f32 %v351_v2, 0.0  ;;  %v353_v12 = vadd.f32 %v954_v31, %v330_v8 }
 0x10c   :  { %709 = vmatprep.subr.mxu0 %v387_v23  ;;  %791 = vmatprep.subr.mxu1 %v387_v23  ;;  %v375_v11 = vmax.f32 %v359_v3, 0.0  ;;  %v361_v13 = vadd.f32 %v954_v31, %v338_v9  ;;  %v368_v14 = vmax.f32 %v352_v6, 0.0 }
 0x10d   :  { %710 = vmatpush3.msra.mxu0 %v387_v23  ;;  %807 = vmatpush3.msra.mxu1 %v387_v23  ;;  %v376_v15 = vmax.f32 %v360_v7, 0.0  ;;  %v369_v16 = vmax.f32 %v353_v12, 0.0 }
 0x10e   :  { %711 = vmatprep.subr.mxu0 %v386_v24  ;;  %792 = vmatprep.subr.mxu1 %v386_v24  ;;  %v377_v17 = vmax.f32 %v361_v13, 0.0 }
 0x10f   :  { %712 = vmatpush3.msra.mxu0 %v386_v24  ;;  %808 = vmatpush3.msra.mxu1 %v386_v24 }
 0x110   :  { %713 = vmatprep.subr.mxu0 %v385_v25  ;;  %793 = vmatprep.subr.mxu1 %v385_v25 }
 0x111   :  { %714 = vmatpush3.msra.mxu0 %v385_v25  ;;  %809 = vmatpush3.msra.mxu1 %v385_v25 }
 0x112   :  { %715 = vmatprep.subr.mxu0 %v384_v26  ;;  %794 = vmatprep.subr.mxu1 %v384_v26 }
 0x113   :  { %716 = vmatpush3.msra.mxu0 %v384_v26  ;;  %810 = vmatpush3.msra.mxu1 %v384_v26 }
 0x114   :  { %717 = vmatprep.subr.mxu0 %v383_v27  ;;  %795 = vmatprep.subr.mxu1 %v383_v27 }
 0x115   :  { %718 = vmatpush3.msra.mxu0 %v383_v27  ;;  %811 = vmatpush3.msra.mxu1 %v383_v27 }
 0x116   :  { %719 = vmatprep.subr.mxu0 %v382_v28  ;;  %796 = vmatprep.subr.mxu1 %v382_v28 }
 0x117   :  { %720 = vmatpush3.msra.mxu0 %v382_v28  ;;  %812 = vmatpush3.msra.mxu1 %v382_v28 }
 0x118   :  { %721 = vmatprep.subr.mxu0 %v381_v29  ;;  %797 = vmatprep.subr.mxu1 %v381_v29 }
 0x119   :  { %722 = vmatpush3.msra.mxu0 %v381_v29  ;;  %813 = vmatpush3.msra.mxu1 %v381_v29 }
 0x11a   :  { %723 = vmatprep.subr.mxu0 %v380_v35  ;;  %798 = vmatprep.subr.mxu1 %v380_v35 }
 0x11b   :  { %724 = vmatpush3.msra.mxu0 %v380_v35  ;;  %814 = vmatpush3.msra.mxu1 %v380_v35 }
 0x11c   :  { %725 = vmatprep.subr.mxu0 %v379_v40  ;;  %799 = vmatprep.subr.mxu1 %v379_v40 }
 0x11d   :  { %726 = vmatpush3.msra.mxu0 %v379_v40  ;;  %815 = vmatpush3.msra.mxu1 %v379_v40 }
 0x11e   :  { %727 = vmatprep.subr.mxu0 %v378_v47  ;;  %800 = vmatprep.subr.mxu1 %v378_v47 }
 0x11f   :  { %728 = vmatpush3.msra.mxu0 %v378_v47  ;;  %816 = vmatpush3.msra.mxu1 %v378_v47 }
 0x120   :  { %729 = vmatprep.mubr.f32.mxu0 %v362_v50  ;;  %741 = vmatprep.mubr.f32.mxu1 %v370_v51 }
 0x121   :  { %730 = vmatmul.mubr.f32.vlgmr.msra.gmra.mxu0 %v363_v52  ;;  %742 = vmatmul.mubr.f32.vlgmr.msra.gmra.mxu1 %v371_v53 }
 0x122   :  { %732 = vmatprep.mubr.f32.mxu0 %v364_v56  ;;  %744 = vmatprep.mubr.f32.mxu1 %v372_v57 }
 0x125   :  { %733 = vmatmul.mubr.f32.gmra.mxu0 %v365_v0  ;;  %745 = vmatmul.mubr.f32.gmra.mxu1 %v373_v1 }
 0x126   :  { %735 = vmatprep.mubr.f32.mxu0 %v366_v4  ;;  %747 = vmatprep.mubr.f32.mxu1 %v374_v5 }
 0x129   :  { %736 = vmatmul.mubr.f32.gmra.mxu0 %v367_v10  ;;  %748 = vmatmul.mubr.f32.gmra.mxu1 %v375_v11 }
 0x12a   :  { %738 = vmatprep.mubr.f32.mxu0 %v368_v14  ;;  %750 = vmatprep.mubr.f32.mxu1 %v376_v15 }
 0x12d   :  { %739 = vmatmul.mubr.f32.gmra.mxu0 %v369_v16  ;;  %751 = vmatmul.mubr.f32.gmra.mxu1 %v377_v17 }
 0x1e1   :  { %v731_v18 = vpop.f32.mrf.mxu0  ;;  %v743_v19 = vpop.f32.mrf.mxu1 }
 0x1e2   :  { %540 = vst [vmem:[%s1033_s6 + $0x8] sm:$0xff] %v731_v18  ;;  %548 = vst [vmem:[%s1033_s6 + $0x48] sm:$0xff] %v743_v19 }
 0x1e3   :  { %v460_v20 = vpop.f32.mrf.mxu0  ;;  %v500_v21 = vpop.f32.mrf.mxu1 }
 0x1e4   :  { %539 = vst [vmem:[%s1033_s6] sm:$0xff] %v460_v20  ;;  %547 = vst [vmem:[%s1033_s6 + $0x40] sm:$0xff] %v500_v21 }
 0x1e5   :  { %v734_v22 = vpop.f32.mrf.mxu0  ;;  %v746_v23 = vpop.f32.mrf.mxu1 }
 0x1e6   :  { %542 = vst [vmem:[%s1033_s6 + $0x18] sm:$0xff] %v734_v22  ;;  %550 = vst [vmem:[%s1033_s6 + $0x58] sm:$0xff] %v746_v23 }
 0x1e7   :  { %v470_v24 = vpop.f32.mrf.mxu0  ;;  %v510_v25 = vpop.f32.mrf.mxu1 }
 0x1e8   :  { %541 = vst [vmem:[%s1033_s6 + $0x10] sm:$0xff] %v470_v24  ;;  %549 = vst [vmem:[%s1033_s6 + $0x50] sm:$0xff] %v510_v25 }
 0x1e9   :  { %v737_v26 = vpop.f32.mrf.mxu0  ;;  %v749_v27 = vpop.f32.mrf.mxu1 }
 0x1ea   :  { %544 = vst [vmem:[%s1033_s6 + $0x28] sm:$0xff] %v737_v26  ;;  %552 = vst [vmem:[%s1033_s6 + $0x68] sm:$0xff] %v749_v27 }
 0x1eb   :  { %v480_v28 = vpop.f32.mrf.mxu0  ;;  %v520_v29 = vpop.f32.mrf.mxu1 }
 0x1ec   :  { %543 = vst [vmem:[%s1033_s6 + $0x20] sm:$0xff] %v480_v28  ;;  %551 = vst [vmem:[%s1033_s6 + $0x60] sm:$0xff] %v520_v29 }
 0x1ed   :  { %v740_v30 = vpop.f32.mrf.mxu0  ;;  %v752_v31 = vpop.f32.mrf.mxu1 }
 0x1ee   :  { %546 = vst [vmem:[%s1033_s6 + $0x38] sm:$0xff] %v740_v30  ;;  %554 = vst [vmem:[%s1033_s6 + $0x78] sm:$0xff] %v752_v31 }
 0x1ef   :  { %v490_v32 = vpop.f32.mrf.mxu0  ;;  %v530_v33 = vpop.f32.mrf.mxu1 }
 0x1f0   :  { %545 = vst [vmem:[%s1033_s6 + $0x30] sm:$0xff] %v490_v32  ;;  %553 = vst [vmem:[%s1033_s6 + $0x70] sm:$0xff] %v530_v33 }

</bundles_post_ra>
